<compile_context>
chip_gen: v5e
topology: v5e:2x2
jax: 0.10.0
libtpu: 0.0.40
codegen_flags: <defaults>
</compile_context>

<pallas_src>
import jax
import jax.numpy as jnp
from jax.experimental import pallas as pl
from jax.experimental.pallas import tpu as pltpu


# ---------------- model hyper-parameters (small, consistent with module) ----
INPUT_SIZE = 4      # input_size
HIDDEN = 32         # hidden_size  (4*H == 128 lanes, one full vreg width)
NUM_LAYERS = 2
OUTPUT_SIZE = 1
BATCH = 2
BATCH_PAD = 8       # pad batch to full sublane tile
SEQ = 8


def lstm_kernel(x2d_ref,              # [T*Bp, I]  time-major, batch-padded
                wih0_ref,             # [I, 4H]
                b0_ref,               # [1, 4H]    (b_ih0 + b_hh0)
                whh0_ref,             # [H, 4H]
                w1cat_ref,            # [2H, 4H]   rows 0:H = W_ih1^T, H:2H = W_hh1^T
                b1_ref,               # [1, 4H]    (b_ih1 + b_hh1)
                wfc_ref,              # [1, H]     fc.weight
                bfc_ref,              # [1, 1]     fc.bias
                out_ref):             # [Bp, 1]
    H = HIDDEN
    Bp = BATCH_PAD
    T = SEQ

    # ---- hoisted layer-0 input projection for ALL timesteps (one MXU GEMM) ----
    xg = jnp.dot(x2d_ref[...], wih0_ref[...],
                 preferred_element_type=jnp.float32) + b0_ref[...]   # [T*Bp, 4H]

    whh0 = whh0_ref[...]
    w1cat = w1cat_ref[...]
    # hoist bias broadcast out of the recurrence (JAX does not CSE broadcasts)
    b1 = jnp.broadcast_to(b1_ref[...], (Bp, 4 * H))

    def gates_to_hc(gates, c):
        # full-width EUP passes over the whole [Bp, 128] tile, then lane slices
        sig = jax.nn.sigmoid(gates)
        th = jnp.tanh(gates)
        i = sig[:, 0 * H:1 * H]
        f = sig[:, 1 * H:2 * H]
        g = th[:, 2 * H:3 * H]
        o = sig[:, 3 * H:4 * H]
        c_new = f * c + i * g
        h_new = o * jnp.tanh(c_new)
        return h_new, c_new

    zeros = jnp.zeros((Bp, H), jnp.float32)
    h1, c1, h2, c2 = zeros, zeros, zeros, zeros

    # ---- static, fully-unrolled time loop (T is a compile-time constant) ----
    for t in range(T):
        # layer 0: only the recurrent matmul remains on the serial path
        g1 = xg[t * Bp:(t + 1) * Bp, :] + jnp.dot(
            h1, whh0, preferred_element_type=jnp.float32)
        h1, c1 = gates_to_hc(g1, c1)

        # layer 1: single fused matmul over concatenated [h1, h2_prev]
        hin = jnp.concatenate([h1, h2], axis=-1)                     # [Bp, 2H]
        g2 = jnp.dot(hin, w1cat, preferred_element_type=jnp.float32) + b1
        h2, c2 = gates_to_hc(g2, c2)

    # ---- fc head: lane-friendly VPU reduction (avoids an N=1 MXU matmul) ----
    y = jnp.sum(h2 * wfc_ref[...], axis=-1, keepdims=True) + bfc_ref[...]
    out_ref[...] = y.astype(out_ref.dtype)


def lstm_model_forward(x, params):
    """x: [B, T, I] float32.  Returns [B, 1] float32."""
    B, T, I = x.shape
    Bp = BATCH_PAD

    # time-major + batch padding (padded rows are independent junk, sliced off)
    x_tm = jnp.transpose(x, (1, 0, 2))                       # [T, B, I]
    x_tm = jnp.pad(x_tm, ((0, 0), (0, Bp - B), (0, 0)))      # [T, Bp, I]
    x2d = x_tm.reshape(T * Bp, I)                            # [T*Bp, I]

    (wih0, b0, whh0, w1cat, b1, wfc, bfc) = params

    vmem = pl.BlockSpec(memory_space=pltpu.MemorySpace.VMEM)

    out = pl.pallas_call(
        lstm_kernel,
        out_shape=jax.ShapeDtypeStruct((Bp, 1), jnp.float32),
        in_specs=[vmem] * 8,
        out_specs=vmem,
    )(x2d, wih0, b0, whh0, w1cat, b1, wfc, bfc)

    return out[:B]


def init_params(key):
    """Deterministic params, PyTorch-style uniform(-1/sqrt(H), 1/sqrt(H)).
    Weights are stored pre-transposed ([in_dim, 4H]); layer-1 W_ih/W_hh are
    pre-concatenated along the contraction dim."""
    H = HIDDEN
    k = 1.0 / jnp.sqrt(jnp.float32(H))
    keys = jax.random.split(key, 10)
    u = lambda kk, shape: jax.random.uniform(kk, shape, jnp.float32, -k, k)

    wih0 = u(keys[0], (INPUT_SIZE, 4 * H))                      # W_ih_l0^T
    whh0 = u(keys[1], (H, 4 * H))                               # W_hh_l0^T
    b0 = u(keys[2], (1, 4 * H)) + u(keys[3], (1, 4 * H))        # b_ih_l0 + b_hh_l0
    wih1 = u(keys[4], (H, 4 * H))                               # W_ih_l1^T
    whh1 = u(keys[5], (H, 4 * H))                               # W_hh_l1^T
    w1cat = jnp.concatenate([wih1, whh1], axis=0)               # [2H, 4H]
    b1 = u(keys[6], (1, 4 * H)) + u(keys[7], (1, 4 * H))        # b_ih_l1 + b_hh_l1
    wfc = u(keys[8], (1, H))                                    # fc.weight
    bfc = u(keys[9], (1, 1))                                    # fc.bias
    return (wih0, b0, whh0, w1cat, b1, wfc, bfc)


def reference_forward(x, params):
    """Pure-JAX reference (lax.scan) for verification."""
    (wih0, b0, whh0, w1cat, b1, wfc, bfc) = params
    H = HIDDEN
    B = x.shape[0]
    wih1, whh1 = w1cat[:H], w1cat[H:]

    def cell(h, c, xin, wih, whh, b):
        g = xin @ wih + h @ whh + b
        i = jax.nn.sigmoid(g[:, 0 * H:1 * H])
        f = jax.nn.sigmoid(g[:, 1 * H:2 * H])
        gg = jnp.tanh(g[:, 2 * H:3 * H])
        o = jax.nn.sigmoid(g[:, 3 * H:4 * H])
        c = f * c + i * gg
        return o * jnp.tanh(c), c

    def step(carry, x_t):
        h1, c1, h2, c2 = carry
        h1, c1 = cell(h1, c1, x_t, wih0, whh0, b0)
        h2, c2 = cell(h2, c2, h1, wih1, whh1, b1)
        return (h1, c1, h2, c2), None

    z = jnp.zeros((B, H), jnp.float32)
    (_, _, h2, _), _ = jax.lax.scan(step, (z, z, z, z),
                                    jnp.transpose(x, (1, 0, 2)))
    return jnp.sum(h2 * wfc, axis=-1, keepdims=True) + bfc


if __name__ == "__main__":
    key = jax.random.PRNGKey(0)
    k_param, k_x = jax.random.split(key)
    params = init_params(k_param)
    x = jax.random.normal(k_x, (BATCH, SEQ, INPUT_SIZE), jnp.float32)

    out = lstm_model_forward(x, params)
    out = jax.block_until_ready(out)

    ref = reference_forward(x, params)
    assert out.shape == (BATCH, OUTPUT_SIZE)
    assert jnp.allclose(out, ref, atol=1e-4, rtol=1e-4), (out, ref)

    print("KERNEL_OK")
</pallas_src>

<mosaic_0001>
module attributes {stable_mosaic.version = 11 : i64} {
  func.func @lstm_kernel(%arg0: memref<64x4xf32, #tpu.memory_space<vmem>>, %arg1: memref<4x128xf32, #tpu.memory_space<vmem>>, %arg2: memref<1x128xf32, #tpu.memory_space<vmem>>, %arg3: memref<32x128xf32, #tpu.memory_space<vmem>>, %arg4: memref<64x128xf32, #tpu.memory_space<vmem>>, %arg5: memref<1x128xf32, #tpu.memory_space<vmem>>, %arg6: memref<1x32xf32, #tpu.memory_space<vmem>>, %arg7: memref<1x1xf32, #tpu.memory_space<vmem>>, %arg8: memref<8x1xf32, #tpu.memory_space<vmem>>) attributes {dimension_semantics = [], scalar_prefetch = 0 : i64, scratch_operands = 0 : i64, tpu.core_type = #tpu.core_type<tc>} {
    %c0 = arith.constant 0 : index
    %c0_0 = arith.constant 0 : index
    %0 = vector.load %arg0[%c0, %c0_0] : memref<64x4xf32, #tpu.memory_space<vmem>>, vector<64x4xf32>
    %c0_1 = arith.constant 0 : index
    %c0_2 = arith.constant 0 : index
    %1 = vector.load %arg1[%c0_1, %c0_2] : memref<4x128xf32, #tpu.memory_space<vmem>>, vector<4x128xf32>
    %cst = arith.constant dense<0.000000e+00> : vector<64x128xf32>
    %2 = tpu.matmul %0, %1, %cst {dimension_numbers = #tpu.dot_dimension_numbers<[1], [0], [0], [1], [0, 0, 1, 1], [], []>} : vector<64x4xf32>, vector<4x128xf32>, vector<64x128xf32> -> vector<64x128xf32>
    %c0_3 = arith.constant 0 : index
    %c0_4 = arith.constant 0 : index
    %3 = vector.load %arg2[%c0_3, %c0_4] : memref<1x128xf32, #tpu.memory_space<vmem>>, vector<1x128xf32>
    %4 = vector.broadcast %3 : vector<1x128xf32> to vector<64x128xf32>
    %5 = arith.addf %2, %4 : vector<64x128xf32>
    %c0_5 = arith.constant 0 : index
    %c0_6 = arith.constant 0 : index
    %6 = vector.load %arg3[%c0_5, %c0_6] : memref<32x128xf32, #tpu.memory_space<vmem>>, vector<32x128xf32>
    %c0_7 = arith.constant 0 : index
    %c0_8 = arith.constant 0 : index
    %7 = vector.load %arg4[%c0_7, %c0_8] : memref<64x128xf32, #tpu.memory_space<vmem>>, vector<64x128xf32>
    %c0_9 = arith.constant 0 : index
    %c0_10 = arith.constant 0 : index
    %8 = vector.load %arg5[%c0_9, %c0_10] : memref<1x128xf32, #tpu.memory_space<vmem>>, vector<1x128xf32>
    %9 = vector.shape_cast %8 : vector<1x128xf32> to vector<1x128xf32>
    %10 = vector.broadcast %9 : vector<1x128xf32> to vector<8x128xf32>
    %cst_11 = arith.constant 0.000000e+00 : f32
    %11 = vector.broadcast %cst_11 : f32 to vector<8x32xf32>
    %12 = vector.extract_strided_slice %5 {offsets = [0, 0], sizes = [8, 128], strides = [1, 1]} : vector<64x128xf32> to vector<8x128xf32>
    %cst_12 = arith.constant dense<0.000000e+00> : vector<8x128xf32>
    %13 = tpu.matmul %11, %6, %cst_12 {dimension_numbers = #tpu.dot_dimension_numbers<[1], [0], [0], [1], [0, 0, 1, 1], [], []>} : vector<8x32xf32>, vector<32x128xf32>, vector<8x128xf32> -> vector<8x128xf32>
    %14 = arith.addf %12, %13 : vector<8x128xf32>
    %15 = arith.negf %14 : vector<8x128xf32>
    %16 = math.exp %15 : vector<8x128xf32>
    %cst_13 = arith.constant 1.000000e+00 : f32
    %17 = vector.broadcast %cst_13 : f32 to vector<8x128xf32>
    %18 = arith.addf %17, %16 : vector<8x128xf32>
    %19 = arith.divf %17, %18 : vector<8x128xf32>
    %20 = math.tanh %14 : vector<8x128xf32>
    %21 = vector.extract_strided_slice %19 {offsets = [0, 0], sizes = [8, 32], strides = [1, 1]} : vector<8x128xf32> to vector<8x32xf32>
    %22 = vector.extract_strided_slice %19 {offsets = [0, 32], sizes = [8, 32], strides = [1, 1]} : vector<8x128xf32> to vector<8x32xf32>
    %23 = vector.extract_strided_slice %20 {offsets = [0, 64], sizes = [8, 32], strides = [1, 1]} : vector<8x128xf32> to vector<8x32xf32>
    %24 = vector.extract_strided_slice %19 {offsets = [0, 96], sizes = [8, 32], strides = [1, 1]} : vector<8x128xf32> to vector<8x32xf32>
    %25 = arith.mulf %22, %11 : vector<8x32xf32>
    %26 = arith.mulf %21, %23 : vector<8x32xf32>
    %27 = arith.addf %25, %26 : vector<8x32xf32>
    %28 = math.tanh %27 : vector<8x32xf32>
    %29 = arith.mulf %24, %28 : vector<8x32xf32>
    %30 = tpu.concatenate %29, %11 in 1 : vector<8x32xf32>, vector<8x32xf32> -> vector<8x64xf32>
    %cst_14 = arith.constant dense<0.000000e+00> : vector<8x128xf32>
    %31 = tpu.matmul %30, %7, %cst_14 {dimension_numbers = #tpu.dot_dimension_numbers<[1], [0], [0], [1], [0, 0, 1, 1], [], []>} : vector<8x64xf32>, vector<64x128xf32>, vector<8x128xf32> -> vector<8x128xf32>
    %32 = arith.addf %31, %10 : vector<8x128xf32>
    %33 = arith.negf %32 : vector<8x128xf32>
    %34 = math.exp %33 : vector<8x128xf32>
    %cst_15 = arith.constant 1.000000e+00 : f32
    %35 = vector.broadcast %cst_15 : f32 to vector<8x128xf32>
    %36 = arith.addf %35, %34 : vector<8x128xf32>
    %37 = arith.divf %35, %36 : vector<8x128xf32>
    %38 = math.tanh %32 : vector<8x128xf32>
    %39 = vector.extract_strided_slice %37 {offsets = [0, 0], sizes = [8, 32], strides = [1, 1]} : vector<8x128xf32> to vector<8x32xf32>
    %40 = vector.extract_strided_slice %37 {offsets = [0, 32], sizes = [8, 32], strides = [1, 1]} : vector<8x128xf32> to vector<8x32xf32>
    %41 = vector.extract_strided_slice %38 {offsets = [0, 64], sizes = [8, 32], strides = [1, 1]} : vector<8x128xf32> to vector<8x32xf32>
    %42 = vector.extract_strided_slice %37 {offsets = [0, 96], sizes = [8, 32], strides = [1, 1]} : vector<8x128xf32> to vector<8x32xf32>
    %43 = arith.mulf %40, %11 : vector<8x32xf32>
    %44 = arith.mulf %39, %41 : vector<8x32xf32>
    %45 = arith.addf %43, %44 : vector<8x32xf32>
    %46 = math.tanh %45 : vector<8x32xf32>
    %47 = arith.mulf %42, %46 : vector<8x32xf32>
    %48 = vector.extract_strided_slice %5 {offsets = [8, 0], sizes = [8, 128], strides = [1, 1]} : vector<64x128xf32> to vector<8x128xf32>
    %cst_16 = arith.constant dense<0.000000e+00> : vector<8x128xf32>
    %49 = tpu.matmul %29, %6, %cst_16 {dimension_numbers = #tpu.dot_dimension_numbers<[1], [0], [0], [1], [0, 0, 1, 1], [], []>} : vector<8x32xf32>, vector<32x128xf32>, vector<8x128xf32> -> vector<8x128xf32>
    %50 = arith.addf %48, %49 : vector<8x128xf32>
    %51 = arith.negf %50 : vector<8x128xf32>
    %52 = math.exp %51 : vector<8x128xf32>
    %cst_17 = arith.constant 1.000000e+00 : f32
    %53 = vector.broadcast %cst_17 : f32 to vector<8x128xf32>
    %54 = arith.addf %53, %52 : vector<8x128xf32>
    %55 = arith.divf %53, %54 : vector<8x128xf32>
    %56 = math.tanh %50 : vector<8x128xf32>
    %57 = vector.extract_strided_slice %55 {offsets = [0, 0], sizes = [8, 32], strides = [1, 1]} : vector<8x128xf32> to vector<8x32xf32>
    %58 = vector.extract_strided_slice %55 {offsets = [0, 32], sizes = [8, 32], strides = [1, 1]} : vector<8x128xf32> to vector<8x32xf32>
    %59 = vector.extract_strided_slice %56 {offsets = [0, 64], sizes = [8, 32], strides = [1, 1]} : vector<8x128xf32> to vector<8x32xf32>
    %60 = vector.extract_strided_slice %55 {offsets = [0, 96], sizes = [8, 32], strides = [1, 1]} : vector<8x128xf32> to vector<8x32xf32>
    %61 = arith.mulf %58, %27 : vector<8x32xf32>
    %62 = arith.mulf %57, %59 : vector<8x32xf32>
    %63 = arith.addf %61, %62 : vector<8x32xf32>
    %64 = math.tanh %63 : vector<8x32xf32>
    %65 = arith.mulf %60, %64 : vector<8x32xf32>
    %66 = tpu.concatenate %65, %47 in 1 : vector<8x32xf32>, vector<8x32xf32> -> vector<8x64xf32>
    %cst_18 = arith.constant dense<0.000000e+00> : vector<8x128xf32>
    %67 = tpu.matmul %66, %7, %cst_18 {dimension_numbers = #tpu.dot_dimension_numbers<[1], [0], [0], [1], [0, 0, 1, 1], [], []>} : vector<8x64xf32>, vector<64x128xf32>, vector<8x128xf32> -> vector<8x128xf32>
    %68 = arith.addf %67, %10 : vector<8x128xf32>
    %69 = arith.negf %68 : vector<8x128xf32>
    %70 = math.exp %69 : vector<8x128xf32>
    %cst_19 = arith.constant 1.000000e+00 : f32
    %71 = vector.broadcast %cst_19 : f32 to vector<8x128xf32>
    %72 = arith.addf %71, %70 : vector<8x128xf32>
    %73 = arith.divf %71, %72 : vector<8x128xf32>
    %74 = math.tanh %68 : vector<8x128xf32>
    %75 = vector.extract_strided_slice %73 {offsets = [0, 0], sizes = [8, 32], strides = [1, 1]} : vector<8x128xf32> to vector<8x32xf32>
    %76 = vector.extract_strided_slice %73 {offsets = [0, 32], sizes = [8, 32], strides = [1, 1]} : vector<8x128xf32> to vector<8x32xf32>
    %77 = vector.extract_strided_slice %74 {offsets = [0, 64], sizes = [8, 32], strides = [1, 1]} : vector<8x128xf32> to vector<8x32xf32>
    %78 = vector.extract_strided_slice %73 {offsets = [0, 96], sizes = [8, 32], strides = [1, 1]} : vector<8x128xf32> to vector<8x32xf32>
    %79 = arith.mulf %76, %45 : vector<8x32xf32>
    %80 = arith.mulf %75, %77 : vector<8x32xf32>
    %81 = arith.addf %79, %80 : vector<8x32xf32>
    %82 = math.tanh %81 : vector<8x32xf32>
    %83 = arith.mulf %78, %82 : vector<8x32xf32>
    %84 = vector.extract_strided_slice %5 {offsets = [16, 0], sizes = [8, 128], strides = [1, 1]} : vector<64x128xf32> to vector<8x128xf32>
    %cst_20 = arith.constant dense<0.000000e+00> : vector<8x128xf32>
    %85 = tpu.matmul %65, %6, %cst_20 {dimension_numbers = #tpu.dot_dimension_numbers<[1], [0], [0], [1], [0, 0, 1, 1], [], []>} : vector<8x32xf32>, vector<32x128xf32>, vector<8x128xf32> -> vector<8x128xf32>
    %86 = arith.addf %84, %85 : vector<8x128xf32>
    %87 = arith.negf %86 : vector<8x128xf32>
    %88 = math.exp %87 : vector<8x128xf32>
    %cst_21 = arith.constant 1.000000e+00 : f32
    %89 = vector.broadcast %cst_21 : f32 to vector<8x128xf32>
    %90 = arith.addf %89, %88 : vector<8x128xf32>
    %91 = arith.divf %89, %90 : vector<8x128xf32>
    %92 = math.tanh %86 : vector<8x128xf32>
    %93 = vector.extract_strided_slice %91 {offsets = [0, 0], sizes = [8, 32], strides = [1, 1]} : vector<8x128xf32> to vector<8x32xf32>
    %94 = vector.extract_strided_slice %91 {offsets = [0, 32], sizes = [8, 32], strides = [1, 1]} : vector<8x128xf32> to vector<8x32xf32>
    %95 = vector.extract_strided_slice %92 {offsets = [0, 64], sizes = [8, 32], strides = [1, 1]} : vector<8x128xf32> to vector<8x32xf32>
    %96 = vector.extract_strided_slice %91 {offsets = [0, 96], sizes = [8, 32], strides = [1, 1]} : vector<8x128xf32> to vector<8x32xf32>
    %97 = arith.mulf %94, %63 : vector<8x32xf32>
    %98 = arith.mulf %93, %95 : vector<8x32xf32>
    %99 = arith.addf %97, %98 : vector<8x32xf32>
    %100 = math.tanh %99 : vector<8x32xf32>
    %101 = arith.mulf %96, %100 : vector<8x32xf32>
    %102 = tpu.concatenate %101, %83 in 1 : vector<8x32xf32>, vector<8x32xf32> -> vector<8x64xf32>
    %cst_22 = arith.constant dense<0.000000e+00> : vector<8x128xf32>
    %103 = tpu.matmul %102, %7, %cst_22 {dimension_numbers = #tpu.dot_dimension_numbers<[1], [0], [0], [1], [0, 0, 1, 1], [], []>} : vector<8x64xf32>, vector<64x128xf32>, vector<8x128xf32> -> vector<8x128xf32>
    %104 = arith.addf %103, %10 : vector<8x128xf32>
    %105 = arith.negf %104 : vector<8x128xf32>
    %106 = math.exp %105 : vector<8x128xf32>
    %cst_23 = arith.constant 1.000000e+00 : f32
    %107 = vector.broadcast %cst_23 : f32 to vector<8x128xf32>
    %108 = arith.addf %107, %106 : vector<8x128xf32>
    %109 = arith.divf %107, %108 : vector<8x128xf32>
    %110 = math.tanh %104 : vector<8x128xf32>
    %111 = vector.extract_strided_slice %109 {offsets = [0, 0], sizes = [8, 32], strides = [1, 1]} : vector<8x128xf32> to vector<8x32xf32>
    %112 = vector.extract_strided_slice %109 {offsets = [0, 32], sizes = [8, 32], strides = [1, 1]} : vector<8x128xf32> to vector<8x32xf32>
    %113 = vector.extract_strided_slice %110 {offsets = [0, 64], sizes = [8, 32], strides = [1, 1]} : vector<8x128xf32> to vector<8x32xf32>
    %114 = vector.extract_strided_slice %109 {offsets = [0, 96], sizes = [8, 32], strides = [1, 1]} : vector<8x128xf32> to vector<8x32xf32>
    %115 = arith.mulf %112, %81 : vector<8x32xf32>
    %116 = arith.mulf %111, %113 : vector<8x32xf32>
    %117 = arith.addf %115, %116 : vector<8x32xf32>
    %118 = math.tanh %117 : vector<8x32xf32>
    %119 = arith.mulf %114, %118 : vector<8x32xf32>
    %120 = vector.extract_strided_slice %5 {offsets = [24, 0], sizes = [8, 128], strides = [1, 1]} : vector<64x128xf32> to vector<8x128xf32>
    %cst_24 = arith.constant dense<0.000000e+00> : vector<8x128xf32>
    %121 = tpu.matmul %101, %6, %cst_24 {dimension_numbers = #tpu.dot_dimension_numbers<[1], [0], [0], [1], [0, 0, 1, 1], [], []>} : vector<8x32xf32>, vector<32x128xf32>, vector<8x128xf32> -> vector<8x128xf32>
    %122 = arith.addf %120, %121 : vector<8x128xf32>
    %123 = arith.negf %122 : vector<8x128xf32>
    %124 = math.exp %123 : vector<8x128xf32>
    %cst_25 = arith.constant 1.000000e+00 : f32
    %125 = vector.broadcast %cst_25 : f32 to vector<8x128xf32>
    %126 = arith.addf %125, %124 : vector<8x128xf32>
    %127 = arith.divf %125, %126 : vector<8x128xf32>
    %128 = math.tanh %122 : vector<8x128xf32>
    %129 = vector.extract_strided_slice %127 {offsets = [0, 0], sizes = [8, 32], strides = [1, 1]} : vector<8x128xf32> to vector<8x32xf32>
    %130 = vector.extract_strided_slice %127 {offsets = [0, 32], sizes = [8, 32], strides = [1, 1]} : vector<8x128xf32> to vector<8x32xf32>
    %131 = vector.extract_strided_slice %128 {offsets = [0, 64], sizes = [8, 32], strides = [1, 1]} : vector<8x128xf32> to vector<8x32xf32>
    %132 = vector.extract_strided_slice %127 {offsets = [0, 96], sizes = [8, 32], strides = [1, 1]} : vector<8x128xf32> to vector<8x32xf32>
    %133 = arith.mulf %130, %99 : vector<8x32xf32>
    %134 = arith.mulf %129, %131 : vector<8x32xf32>
    %135 = arith.addf %133, %134 : vector<8x32xf32>
    %136 = math.tanh %135 : vector<8x32xf32>
    %137 = arith.mulf %132, %136 : vector<8x32xf32>
    %138 = tpu.concatenate %137, %119 in 1 : vector<8x32xf32>, vector<8x32xf32> -> vector<8x64xf32>
    %cst_26 = arith.constant dense<0.000000e+00> : vector<8x128xf32>
    %139 = tpu.matmul %138, %7, %cst_26 {dimension_numbers = #tpu.dot_dimension_numbers<[1], [0], [0], [1], [0, 0, 1, 1], [], []>} : vector<8x64xf32>, vector<64x128xf32>, vector<8x128xf32> -> vector<8x128xf32>
    %140 = arith.addf %139, %10 : vector<8x128xf32>
    %141 = arith.negf %140 : vector<8x128xf32>
    %142 = math.exp %141 : vector<8x128xf32>
    %cst_27 = arith.constant 1.000000e+00 : f32
    %143 = vector.broadcast %cst_27 : f32 to vector<8x128xf32>
    %144 = arith.addf %143, %142 : vector<8x128xf32>
    %145 = arith.divf %143, %144 : vector<8x128xf32>
    %146 = math.tanh %140 : vector<8x128xf32>
    %147 = vector.extract_strided_slice %145 {offsets = [0, 0], sizes = [8, 32], strides = [1, 1]} : vector<8x128xf32> to vector<8x32xf32>
    %148 = vector.extract_strided_slice %145 {offsets = [0, 32], sizes = [8, 32], strides = [1, 1]} : vector<8x128xf32> to vector<8x32xf32>
    %149 = vector.extract_strided_slice %146 {offsets = [0, 64], sizes = [8, 32], strides = [1, 1]} : vector<8x128xf32> to vector<8x32xf32>
    %150 = vector.extract_strided_slice %145 {offsets = [0, 96], sizes = [8, 32], strides = [1, 1]} : vector<8x128xf32> to vector<8x32xf32>
    %151 = arith.mulf %148, %117 : vector<8x32xf32>
    %152 = arith.mulf %147, %149 : vector<8x32xf32>
    %153 = arith.addf %151, %152 : vector<8x32xf32>
    %154 = math.tanh %153 : vector<8x32xf32>
    %155 = arith.mulf %150, %154 : vector<8x32xf32>
    %156 = vector.extract_strided_slice %5 {offsets = [32, 0], sizes = [8, 128], strides = [1, 1]} : vector<64x128xf32> to vector<8x128xf32>
    %cst_28 = arith.constant dense<0.000000e+00> : vector<8x128xf32>
    %157 = tpu.matmul %137, %6, %cst_28 {dimension_numbers = #tpu.dot_dimension_numbers<[1], [0], [0], [1], [0, 0, 1, 1], [], []>} : vector<8x32xf32>, vector<32x128xf32>, vector<8x128xf32> -> vector<8x128xf32>
    %158 = arith.addf %156, %157 : vector<8x128xf32>
    %159 = arith.negf %158 : vector<8x128xf32>
    %160 = math.exp %159 : vector<8x128xf32>
    %cst_29 = arith.constant 1.000000e+00 : f32
    %161 = vector.broadcast %cst_29 : f32 to vector<8x128xf32>
    %162 = arith.addf %161, %160 : vector<8x128xf32>
    %163 = arith.divf %161, %162 : vector<8x128xf32>
    %164 = math.tanh %158 : vector<8x128xf32>
    %165 = vector.extract_strided_slice %163 {offsets = [0, 0], sizes = [8, 32], strides = [1, 1]} : vector<8x128xf32> to vector<8x32xf32>
    %166 = vector.extract_strided_slice %163 {offsets = [0, 32], sizes = [8, 32], strides = [1, 1]} : vector<8x128xf32> to vector<8x32xf32>
    %167 = vector.extract_strided_slice %164 {offsets = [0, 64], sizes = [8, 32], strides = [1, 1]} : vector<8x128xf32> to vector<8x32xf32>
    %168 = vector.extract_strided_slice %163 {offsets = [0, 96], sizes = [8, 32], strides = [1, 1]} : vector<8x128xf32> to vector<8x32xf32>
    %169 = arith.mulf %166, %135 : vector<8x32xf32>
    %170 = arith.mulf %165, %167 : vector<8x32xf32>
    %171 = arith.addf %169, %170 : vector<8x32xf32>
    %172 = math.tanh %171 : vector<8x32xf32>
    %173 = arith.mulf %168, %172 : vector<8x32xf32>
    %174 = tpu.concatenate %173, %155 in 1 : vector<8x32xf32>, vector<8x32xf32> -> vector<8x64xf32>
    %cst_30 = arith.constant dense<0.000000e+00> : vector<8x128xf32>
    %175 = tpu.matmul %174, %7, %cst_30 {dimension_numbers = #tpu.dot_dimension_numbers<[1], [0], [0], [1], [0, 0, 1, 1], [], []>} : vector<8x64xf32>, vector<64x128xf32>, vector<8x128xf32> -> vector<8x128xf32>
    %176 = arith.addf %175, %10 : vector<8x128xf32>
    %177 = arith.negf %176 : vector<8x128xf32>
    %178 = math.exp %177 : vector<8x128xf32>
    %cst_31 = arith.constant 1.000000e+00 : f32
    %179 = vector.broadcast %cst_31 : f32 to vector<8x128xf32>
    %180 = arith.addf %179, %178 : vector<8x128xf32>
    %181 = arith.divf %179, %180 : vector<8x128xf32>
    %182 = math.tanh %176 : vector<8x128xf32>
    %183 = vector.extract_strided_slice %181 {offsets = [0, 0], sizes = [8, 32], strides = [1, 1]} : vector<8x128xf32> to vector<8x32xf32>
    %184 = vector.extract_strided_slice %181 {offsets = [0, 32], sizes = [8, 32], strides = [1, 1]} : vector<8x128xf32> to vector<8x32xf32>
    %185 = vector.extract_strided_slice %182 {offsets = [0, 64], sizes = [8, 32], strides = [1, 1]} : vector<8x128xf32> to vector<8x32xf32>
    %186 = vector.extract_strided_slice %181 {offsets = [0, 96], sizes = [8, 32], strides = [1, 1]} : vector<8x128xf32> to vector<8x32xf32>
    %187 = arith.mulf %184, %153 : vector<8x32xf32>
    %188 = arith.mulf %183, %185 : vector<8x32xf32>
    %189 = arith.addf %187, %188 : vector<8x32xf32>
    %190 = math.tanh %189 : vector<8x32xf32>
    %191 = arith.mulf %186, %190 : vector<8x32xf32>
    %192 = vector.extract_strided_slice %5 {offsets = [40, 0], sizes = [8, 128], strides = [1, 1]} : vector<64x128xf32> to vector<8x128xf32>
    %cst_32 = arith.constant dense<0.000000e+00> : vector<8x128xf32>
    %193 = tpu.matmul %173, %6, %cst_32 {dimension_numbers = #tpu.dot_dimension_numbers<[1], [0], [0], [1], [0, 0, 1, 1], [], []>} : vector<8x32xf32>, vector<32x128xf32>, vector<8x128xf32> -> vector<8x128xf32>
    %194 = arith.addf %192, %193 : vector<8x128xf32>
    %195 = arith.negf %194 : vector<8x128xf32>
    %196 = math.exp %195 : vector<8x128xf32>
    %cst_33 = arith.constant 1.000000e+00 : f32
    %197 = vector.broadcast %cst_33 : f32 to vector<8x128xf32>
    %198 = arith.addf %197, %196 : vector<8x128xf32>
    %199 = arith.divf %197, %198 : vector<8x128xf32>
    %200 = math.tanh %194 : vector<8x128xf32>
    %201 = vector.extract_strided_slice %199 {offsets = [0, 0], sizes = [8, 32], strides = [1, 1]} : vector<8x128xf32> to vector<8x32xf32>
    %202 = vector.extract_strided_slice %199 {offsets = [0, 32], sizes = [8, 32], strides = [1, 1]} : vector<8x128xf32> to vector<8x32xf32>
    %203 = vector.extract_strided_slice %200 {offsets = [0, 64], sizes = [8, 32], strides = [1, 1]} : vector<8x128xf32> to vector<8x32xf32>
    %204 = vector.extract_strided_slice %199 {offsets = [0, 96], sizes = [8, 32], strides = [1, 1]} : vector<8x128xf32> to vector<8x32xf32>
    %205 = arith.mulf %202, %171 : vector<8x32xf32>
    %206 = arith.mulf %201, %203 : vector<8x32xf32>
    %207 = arith.addf %205, %206 : vector<8x32xf32>
    %208 = math.tanh %207 : vector<8x32xf32>
    %209 = arith.mulf %204, %208 : vector<8x32xf32>
    %210 = tpu.concatenate %209, %191 in 1 : vector<8x32xf32>, vector<8x32xf32> -> vector<8x64xf32>
    %cst_34 = arith.constant dense<0.000000e+00> : vector<8x128xf32>
    %211 = tpu.matmul %210, %7, %cst_34 {dimension_numbers = #tpu.dot_dimension_numbers<[1], [0], [0], [1], [0, 0, 1, 1], [], []>} : vector<8x64xf32>, vector<64x128xf32>, vector<8x128xf32> -> vector<8x128xf32>
    %212 = arith.addf %211, %10 : vector<8x128xf32>
    %213 = arith.negf %212 : vector<8x128xf32>
    %214 = math.exp %213 : vector<8x128xf32>
    %cst_35 = arith.constant 1.000000e+00 : f32
    %215 = vector.broadcast %cst_35 : f32 to vector<8x128xf32>
    %216 = arith.addf %215, %214 : vector<8x128xf32>
    %217 = arith.divf %215, %216 : vector<8x128xf32>
    %218 = math.tanh %212 : vector<8x128xf32>
    %219 = vector.extract_strided_slice %217 {offsets = [0, 0], sizes = [8, 32], strides = [1, 1]} : vector<8x128xf32> to vector<8x32xf32>
    %220 = vector.extract_strided_slice %217 {offsets = [0, 32], sizes = [8, 32], strides = [1, 1]} : vector<8x128xf32> to vector<8x32xf32>
    %221 = vector.extract_strided_slice %218 {offsets = [0, 64], sizes = [8, 32], strides = [1, 1]} : vector<8x128xf32> to vector<8x32xf32>
    %222 = vector.extract_strided_slice %217 {offsets = [0, 96], sizes = [8, 32], strides = [1, 1]} : vector<8x128xf32> to vector<8x32xf32>
    %223 = arith.mulf %220, %189 : vector<8x32xf32>
    %224 = arith.mulf %219, %221 : vector<8x32xf32>
    %225 = arith.addf %223, %224 : vector<8x32xf32>
    %226 = math.tanh %225 : vector<8x32xf32>
    %227 = arith.mulf %222, %226 : vector<8x32xf32>
    %228 = vector.extract_strided_slice %5 {offsets = [48, 0], sizes = [8, 128], strides = [1, 1]} : vector<64x128xf32> to vector<8x128xf32>
    %cst_36 = arith.constant dense<0.000000e+00> : vector<8x128xf32>
    %229 = tpu.matmul %209, %6, %cst_36 {dimension_numbers = #tpu.dot_dimension_numbers<[1], [0], [0], [1], [0, 0, 1, 1], [], []>} : vector<8x32xf32>, vector<32x128xf32>, vector<8x128xf32> -> vector<8x128xf32>
    %230 = arith.addf %228, %229 : vector<8x128xf32>
    %231 = arith.negf %230 : vector<8x128xf32>
    %232 = math.exp %231 : vector<8x128xf32>
    %cst_37 = arith.constant 1.000000e+00 : f32
    %233 = vector.broadcast %cst_37 : f32 to vector<8x128xf32>
    %234 = arith.addf %233, %232 : vector<8x128xf32>
    %235 = arith.divf %233, %234 : vector<8x128xf32>
    %236 = math.tanh %230 : vector<8x128xf32>
    %237 = vector.extract_strided_slice %235 {offsets = [0, 0], sizes = [8, 32], strides = [1, 1]} : vector<8x128xf32> to vector<8x32xf32>
    %238 = vector.extract_strided_slice %235 {offsets = [0, 32], sizes = [8, 32], strides = [1, 1]} : vector<8x128xf32> to vector<8x32xf32>
    %239 = vector.extract_strided_slice %236 {offsets = [0, 64], sizes = [8, 32], strides = [1, 1]} : vector<8x128xf32> to vector<8x32xf32>
    %240 = vector.extract_strided_slice %235 {offsets = [0, 96], sizes = [8, 32], strides = [1, 1]} : vector<8x128xf32> to vector<8x32xf32>
    %241 = arith.mulf %238, %207 : vector<8x32xf32>
    %242 = arith.mulf %237, %239 : vector<8x32xf32>
    %243 = arith.addf %241, %242 : vector<8x32xf32>
    %244 = math.tanh %243 : vector<8x32xf32>
    %245 = arith.mulf %240, %244 : vector<8x32xf32>
    %246 = tpu.concatenate %245, %227 in 1 : vector<8x32xf32>, vector<8x32xf32> -> vector<8x64xf32>
    %cst_38 = arith.constant dense<0.000000e+00> : vector<8x128xf32>
    %247 = tpu.matmul %246, %7, %cst_38 {dimension_numbers = #tpu.dot_dimension_numbers<[1], [0], [0], [1], [0, 0, 1, 1], [], []>} : vector<8x64xf32>, vector<64x128xf32>, vector<8x128xf32> -> vector<8x128xf32>
    %248 = arith.addf %247, %10 : vector<8x128xf32>
    %249 = arith.negf %248 : vector<8x128xf32>
    %250 = math.exp %249 : vector<8x128xf32>
    %cst_39 = arith.constant 1.000000e+00 : f32
    %251 = vector.broadcast %cst_39 : f32 to vector<8x128xf32>
    %252 = arith.addf %251, %250 : vector<8x128xf32>
    %253 = arith.divf %251, %252 : vector<8x128xf32>
    %254 = math.tanh %248 : vector<8x128xf32>
    %255 = vector.extract_strided_slice %253 {offsets = [0, 0], sizes = [8, 32], strides = [1, 1]} : vector<8x128xf32> to vector<8x32xf32>
    %256 = vector.extract_strided_slice %253 {offsets = [0, 32], sizes = [8, 32], strides = [1, 1]} : vector<8x128xf32> to vector<8x32xf32>
    %257 = vector.extract_strided_slice %254 {offsets = [0, 64], sizes = [8, 32], strides = [1, 1]} : vector<8x128xf32> to vector<8x32xf32>
    %258 = vector.extract_strided_slice %253 {offsets = [0, 96], sizes = [8, 32], strides = [1, 1]} : vector<8x128xf32> to vector<8x32xf32>
    %259 = arith.mulf %256, %225 : vector<8x32xf32>
    %260 = arith.mulf %255, %257 : vector<8x32xf32>
    %261 = arith.addf %259, %260 : vector<8x32xf32>
    %262 = math.tanh %261 : vector<8x32xf32>
    %263 = arith.mulf %258, %262 : vector<8x32xf32>
    %264 = vector.extract_strided_slice %5 {offsets = [56, 0], sizes = [8, 128], strides = [1, 1]} : vector<64x128xf32> to vector<8x128xf32>
    %cst_40 = arith.constant dense<0.000000e+00> : vector<8x128xf32>
    %265 = tpu.matmul %245, %6, %cst_40 {dimension_numbers = #tpu.dot_dimension_numbers<[1], [0], [0], [1], [0, 0, 1, 1], [], []>} : vector<8x32xf32>, vector<32x128xf32>, vector<8x128xf32> -> vector<8x128xf32>
    %266 = arith.addf %264, %265 : vector<8x128xf32>
    %267 = arith.negf %266 : vector<8x128xf32>
    %268 = math.exp %267 : vector<8x128xf32>
    %cst_41 = arith.constant 1.000000e+00 : f32
    %269 = vector.broadcast %cst_41 : f32 to vector<8x128xf32>
    %270 = arith.addf %269, %268 : vector<8x128xf32>
    %271 = arith.divf %269, %270 : vector<8x128xf32>
    %272 = math.tanh %266 : vector<8x128xf32>
    %273 = vector.extract_strided_slice %271 {offsets = [0, 0], sizes = [8, 32], strides = [1, 1]} : vector<8x128xf32> to vector<8x32xf32>
    %274 = vector.extract_strided_slice %271 {offsets = [0, 32], sizes = [8, 32], strides = [1, 1]} : vector<8x128xf32> to vector<8x32xf32>
    %275 = vector.extract_strided_slice %272 {offsets = [0, 64], sizes = [8, 32], strides = [1, 1]} : vector<8x128xf32> to vector<8x32xf32>
    %276 = vector.extract_strided_slice %271 {offsets = [0, 96], sizes = [8, 32], strides = [1, 1]} : vector<8x128xf32> to vector<8x32xf32>
    %277 = arith.mulf %274, %243 : vector<8x32xf32>
    %278 = arith.mulf %273, %275 : vector<8x32xf32>
    %279 = arith.addf %277, %278 : vector<8x32xf32>
    %280 = math.tanh %279 : vector<8x32xf32>
    %281 = arith.mulf %276, %280 : vector<8x32xf32>
    %282 = tpu.concatenate %281, %263 in 1 : vector<8x32xf32>, vector<8x32xf32> -> vector<8x64xf32>
    %cst_42 = arith.constant dense<0.000000e+00> : vector<8x128xf32>
    %283 = tpu.matmul %282, %7, %cst_42 {dimension_numbers = #tpu.dot_dimension_numbers<[1], [0], [0], [1], [0, 0, 1, 1], [], []>} : vector<8x64xf32>, vector<64x128xf32>, vector<8x128xf32> -> vector<8x128xf32>
    %284 = arith.addf %283, %10 : vector<8x128xf32>
    %285 = arith.negf %284 : vector<8x128xf32>
    %286 = math.exp %285 : vector<8x128xf32>
    %cst_43 = arith.constant 1.000000e+00 : f32
    %287 = vector.broadcast %cst_43 : f32 to vector<8x128xf32>
    %288 = arith.addf %287, %286 : vector<8x128xf32>
    %289 = arith.divf %287, %288 : vector<8x128xf32>
    %290 = math.tanh %284 : vector<8x128xf32>
    %291 = vector.extract_strided_slice %289 {offsets = [0, 0], sizes = [8, 32], strides = [1, 1]} : vector<8x128xf32> to vector<8x32xf32>
    %292 = vector.extract_strided_slice %289 {offsets = [0, 32], sizes = [8, 32], strides = [1, 1]} : vector<8x128xf32> to vector<8x32xf32>
    %293 = vector.extract_strided_slice %290 {offsets = [0, 64], sizes = [8, 32], strides = [1, 1]} : vector<8x128xf32> to vector<8x32xf32>
    %294 = vector.extract_strided_slice %289 {offsets = [0, 96], sizes = [8, 32], strides = [1, 1]} : vector<8x128xf32> to vector<8x32xf32>
    %295 = arith.mulf %292, %261 : vector<8x32xf32>
    %296 = arith.mulf %291, %293 : vector<8x32xf32>
    %297 = arith.addf %295, %296 : vector<8x32xf32>
    %298 = math.tanh %297 : vector<8x32xf32>
    %299 = arith.mulf %294, %298 : vector<8x32xf32>
    %c0_44 = arith.constant 0 : index
    %c0_45 = arith.constant 0 : index
    %300 = vector.load %arg6[%c0_44, %c0_45] : memref<1x32xf32, #tpu.memory_space<vmem>>, vector<1x32xf32>
    %301 = vector.broadcast %300 : vector<1x32xf32> to vector<8x32xf32>
    %302 = arith.mulf %299, %301 : vector<8x32xf32>
    %cst_46 = arith.constant dense<0.000000e+00> : vector<8xf32>
    %303 = vector.multi_reduction <add>, %302, %cst_46 [1] : vector<8x32xf32> to vector<8xf32>
    %304 = vector.shape_cast %303 : vector<8xf32> to vector<8x1xf32>
    %c0_47 = arith.constant 0 : index
    %c0_48 = arith.constant 0 : index
    %305 = vector.load %arg7[%c0_47, %c0_48] : memref<1x1xf32, #tpu.memory_space<vmem>>, vector<1x1xf32>
    %306 = vector.broadcast %305 : vector<1x1xf32> to vector<8x1xf32>
    %307 = arith.addf %304, %306 : vector<8x1xf32>
    %c0_49 = arith.constant 0 : index
    %c0_50 = arith.constant 0 : index
    %308 = vector.load %arg8[%c0_49, %c0_50] : memref<8x1xf32, #tpu.memory_space<vmem>>, vector<8x1xf32>
    tpu.vector_store %arg8[%c0_49, %c0_50], %307 {strides = array<i32>} : memref<8x1xf32, #tpu.memory_space<vmem>>, vector<8x1xf32>,
    return
  }
}

</mosaic_0001>

<bundles_post_ra>
// kernel: tpu_custom_call.1
= control target key start
LH: loop header
LB: loop body
LE: loop exit
PB: predicated region body
PF: predicated region fallthrough
CT: control target
= control target key end

     0   :  { %s1829_s0 = inlined_call_operand.vmem [shape: f32[64,4], index: 0, kind: input, shape index: {}]   ;;  %s1830_s1 = inlined_call_operand.vmem [shape: f32[4,128], index: 1, kind: input, shape index: {}]   ;;  %s1831_s2 = inlined_call_operand.vmem [shape: f32[1,128], index: 2, kind: input, shape index: {}]   ;;  %s1832_s3 = inlined_call_operand.hbm [shape: f32[32,128], index: 3, kind: input, shape index: {}]   ;;  %s1833_s4 = inlined_call_operand.vmem [shape: f32[64,128], index: 4, kind: input, shape index: {}]   ;;  %s1834_s5 = inlined_call_operand.vmem [shape: f32[1,128], index: 5, kind: input, shape index: {}]   ;;  %s1835_s6 = inlined_call_operand.vmem [shape: f32[1,32], index: 6, kind: input, shape index: {}]   ;;  %s1836_s7 = inlined_call_operand.<no memory space> [shape: f32[1,1], index: 7, kind: input, shape index: {}]   ;;  %s1837_s8 = inlined_call_operand.vmem [shape: f32[8,1], index: 8, kind: output, shape index: {}]  }
   0x1   :  { %v13_v0 = vstv %s1836_s7 }
   0x2   :  { %14 = vst [vmem:[#allocation2] sm:$0x1] %v13_v0 }
   0x3   :  { %15 = vsyncpa [#allocation4], 0  ;;  %s26_s9 = sshll.u32 %s1832_s3, 4  ;;  %s1410_s10 = smov [#allocation3]   ;;  %s27_s9 = int_to_ptr.hbm [resolvable:$true] %s26_s9 }
   0x4   :  { %s28_s11 = sshll.u32 %s1410_s10, 4  ;;  %s1411_s12 = smov 128   ;;  %s29_s11 = int_to_ptr.vmem [resolvable:$true] %s28_s11 }
   0x5   :  { %s1412_s13 = smov 8  }
   0x6   :  { %34 = dma.hbm_to_vmem [thread:$0]  %s27_s9, 512, %s29_s11, [#allocation4], %s1411_s12, %s1411_s12, %s1412_s13  }
   0x7   :  { %1408 = dma.done.wait [#allocation4], 512  }
   0x8   :  { %1409 = vsyncadd [#allocation4], 4294966784  ;;  %vm85_vm0 = vcmask 1043456   ;;  %vm60_vm1 = vcmask 31744   ;;  %v1468_v1 = vld [vmem:[#allocation3 + $0x18] sm:$0xff]  ;;  %v1470_v2 = vld [vmem:[#allocation3 + $0x10] sm:$0xff] }
   0x9   :  { %v55_v3 = vld [vmem:[%s1830_s1] sm:$0xf]  ;;  %162 = vmatpush.msra.mxu1 %v1468_v1  ;;  %v1479_v5 = vld [vmem:[#allocation3 + $0x8] sm:$0xff]  ;;  %288 = vmatpush.msra.mxu3 %v1468_v1  ;;  %v1413_v7 = vmov 0.0   ;;  %s1414_s17 = smov 64   ;;  %s1415_s18 = smov 32  }
   0xa   :  { %1203 = vmatpush.msk.msra.mxu0 %vm85_vm0, %v55_v3  ;;  %v47_v4 = vld [vmem:[%s1829_s0] sm:$0xff]  ;;  %v1510_v33 = vld [vmem:[%s1833_s4 + $0x38] sm:$0xff]  ;;  %v1515_v34 = vld [vmem:[%s1833_s4 + $0x30] sm:$0xff]  ;;  %vm146_vm6 = vcmask 261120   ;;  %vm213_vm7 = vcmask 523264   ;;  %s1416_s30 = smov 96  }
   0xb   :  { %1204 = vmatmul.msk.f32.vlgmr.msra.gmra.mxu0 %vm60_vm1, %v47_v4  ;;  %163 = vmatpush.msra.mxu1 %v1470_v2  ;;  %v1484_v6 = vld [vmem:[#allocation3] sm:$0xff]  ;;  %v1498_v8 = vld [vmem:[%s1831_s2] ss:$0 sm:$0xff]  ;;  %v1538_v37 = vld [vmem:[%s1833_s4 + $0x18] sm:$0xff] }
   0xc   :  { %289 = vmatpush.msra.mxu3 %v1470_v2  ;;  %225 = vmatpush.msra.mxu2 %v1510_v33  ;;  %v1522_v35 = vld [vmem:[%s1833_s4 + $0x28] sm:$0xff]  ;;  %v1530_v36 = vld [vmem:[%s1833_s4 + $0x20] sm:$0xff]  ;;  %v1546_v38 = vld [vmem:[%s1833_s4 + $0x10] sm:$0xff] }
   0xd   :  { %164 = vmatpush.msra.mxu1 %v1479_v5  ;;  %1128 = vmatpush.msrb.mxu0 %v1510_v33  ;;  %v1554_v39 = vld [vmem:[%s1833_s4 + $0x8] sm:$0xff]  ;;  %v1567_v42 = vld [vmem:[%s1833_s4] sm:$0xff] }
   0xe   :  { %290 = vmatpush.msra.mxu3 %v1479_v5  ;;  %226 = vmatpush.msra.mxu2 %v1515_v34  ;;  %v48_v43 = vld [vmem:[%s1829_s0 + $0x8] sm:$0xff]  ;;  %v1611_v50 = vld [vmem:[%s1834_s5] ss:$0 sm:$0xff] }
   0xf   :  { %165 = vmatpush.msra.mxu1 %v1484_v6  ;;  %1129 = vmatpush.msrb.mxu0 %v1515_v34 }
  0x10   :  { %166 = vmatmul.f32.vlgmr.msra.gmra.mxu1 %v1413_v7  ;;  %291 = vmatpush.msra.mxu3 %v1484_v6 }
  0x11   :  { %354 = vmatpush.msrb.mxu1 %v1510_v33  ;;  %227 = vmatpush.msra.mxu2 %v1522_v35 }
  0x12   :  { %417 = vmatpush.msrb.mxu3 %v1468_v1  ;;  %1130 = vmatpush.msrb.mxu0 %v1522_v35 }
  0x13   :  { %355 = vmatpush.msrb.mxu1 %v1515_v34  ;;  %228 = vmatpush.msra.mxu2 %v1530_v36 }
  0x14   :  { %418 = vmatpush.msrb.mxu3 %v1470_v2  ;;  %1131 = vmatpush.msrb.mxu0 %v1530_v36 }
  0x15   :  { %356 = vmatpush.msrb.mxu1 %v1522_v35  ;;  %229 = vmatpush.msra.mxu2 %v1538_v37 }
  0x16   :  { %419 = vmatpush.msrb.mxu3 %v1479_v5  ;;  %1132 = vmatpush.msrb.mxu0 %v1538_v37 }
  0x17   :  { %357 = vmatpush.msrb.mxu1 %v1530_v36  ;;  %230 = vmatpush.msra.mxu2 %v1546_v38 }
  0x18   :  { %420 = vmatpush.msrb.mxu3 %v1484_v6  ;;  %1133 = vmatpush.msrb.mxu0 %v1546_v38 }
  0x19   :  { %358 = vmatpush.msrb.mxu1 %v1538_v37  ;;  %231 = vmatpush.msra.mxu2 %v1554_v39 }
  0x1a   :  { %1134 = vmatpush.msrb.mxu0 %v1554_v39 }
  0x1b   :  { %359 = vmatpush.msrb.mxu1 %v1546_v38  ;;  %232 = vmatpush.msra.mxu2 %v1567_v42 }
  0x1c   :  { %1205 = vmatmul.msk.f32.gmra.mxu0 %vm60_vm1, %v48_v43 }
  0x1d   :  { %360 = vmatpush.msrb.mxu1 %v1554_v39  ;;  %483 = vmatpush.msrb.mxu2 %v1510_v33 }
  0x1e   :  { %1135 = vmatpush.msrb.mxu0 %v1567_v42 }
  0x1f   :  { %361 = vmatpush.msrb.mxu1 %v1567_v42  ;;  %484 = vmatpush.msrb.mxu2 %v1515_v34 }
  0x21   :  { %612 = vmatpush.msra.mxu1 %v1510_v33  ;;  %485 = vmatpush.msrb.mxu2 %v1522_v35 }
  0x23   :  { %613 = vmatpush.msra.mxu1 %v1515_v34  ;;  %486 = vmatpush.msrb.mxu2 %v1530_v36 }
  0x25   :  { %614 = vmatpush.msra.mxu1 %v1522_v35  ;;  %487 = vmatpush.msrb.mxu2 %v1538_v37 }
  0x27   :  { %615 = vmatpush.msra.mxu1 %v1530_v36  ;;  %488 = vmatpush.msrb.mxu2 %v1546_v38 }
  0x29   :  { %616 = vmatpush.msra.mxu1 %v1538_v37  ;;  %489 = vmatpush.msrb.mxu2 %v1554_v39 }
  0x2b   :  { %617 = vmatpush.msra.mxu1 %v1546_v38  ;;  %490 = vmatpush.msrb.mxu2 %v1567_v42 }
  0x2d   :  { %618 = vmatpush.msra.mxu1 %v1554_v39 }
  0x2f   :  { %619 = vmatpush.msra.mxu1 %v1567_v42 }
  0x88   :  { %v106_v9 = vpop.f32.mrf.mxu0 }
  0x89   :  { %v107_v10 = vadd.f32 %v1498_v8, %v106_v9 }
  0x8d   :  { %v167_v11 = vpop.f32.mrf.mxu1 }
  0x8e   :  { %v170_v12 = vadd.f32 %v167_v11, %v107_v10 }
  0x90   :  { %1254 = vtanh.f32 %v170_v12  ;;  %v1212_v14 = vmul.f32 -1.442695, %v170_v12 }
  0x92   :  { %1256 = vpow2.f32 %v1212_v14 }
  0x96   :  { %v1255_v13 = vpop.eup %1254 }
  0x97   :  { %193 = vrot.lane.b32.xlu0 %v1255_v13, %s1414_s17 }
  0x98   :  { %v1257_v15 = vpop.eup %1256 }
  0x99   :  { %v174_v16 = vadd.f32 1.0, %v1257_v15  ;;  %v109_v46 = vpop.f32.mrf.mxu0 }
  0x9a   :  { %v110_v47 = vadd.f32 %v1498_v8, %v109_v46  ;;  %v49_v46 = vld [vmem:[%s1829_s0 + $0x10] sm:$0xff] }
  0x9b   :  { %1258 = vrcp.f32 %v174_v16  ;;  %v186_v22 = vand.u32 2147483648, %v174_v16  ;;  %vm180_vm3 = vweird.f32 %v174_v16  ;;  %v184_v23 = vand.u32 2147483647, %v174_v16  ;;  %1206 = vmatmul.msk.f32.gmra.mxu0 %vm60_vm1, %v49_v46 }
  0x9d   :  { %v187_v25 = vor.u32 1.1754944e-38, %v186_v22  ;;  %vm185_vm5 = vcmp.eq.f32.partialorder %v184_v23, 8.507059e+37 }
  0xa1   :  { %v1259_v17 = vpop.eup %1258 }
  0xa2   :  { %v176_v18 = vmul.f32 %v1259_v17, %v174_v16  ;;  %vm181_vm2 = vweird.f32 %v1259_v17 }
  0xa3   :  { %vm182_vm4 = vmor %vm180_vm3, %vm181_vm2 }
  0xa4   :  { %v177_v19 = vsub.f32 1.0, %v176_v18 }
  0xa6   :  { %v178_v20 = vmul.f32 %v1259_v17, %v177_v19 }
  0xa8   :  { %v179_v21 = vadd.f32 %v1259_v17, %v178_v20 }
  0xaa   :  { %v183_v24 = vsel %vm182_vm4, %v1259_v17, %v179_v21 }
  0xab   :  { %v188_v27 = vsel %vm185_vm5, %v187_v25, %v183_v24 }
  0xac   :  { %v191_v29 = vmul.f32 0.0, %v188_v27 }
 0x109   :  { %v194_v26 = vpop.permute.xlu0 %193 }
 0x10a   :  { %v196_v28 = vmul.f32 %v194_v26, %v188_v27 }
 0x10c   :  { %198 = vrot.lane.b32.xlu0 %v196_v28, %s1415_s18 }
 0x17e   :  { %v199_v30 = vpop.permute.xlu0 %198 }
 0x17f   :  { %v1503_v31 = vadd.f32 %v199_v30, %v191_v29 }
 0x181   :  { %1260 = vtanh.f32 %v1503_v31 }
 0x187   :  { %v1261_v32 = vpop.eup %1260 }
 0x188   :  { %204 = vrot.lane.b32.xlu1 %v1261_v32, %s1414_s17 }
 0x1fa   :  { %v205_v40 = vpop.permute.xlu1 %204 }
 0x1fb   :  { %v207_v41 = vmul.f32 %v205_v40, %v188_v27 }
 0x1fd   :  { %209 = vrot.lane.b32.xlu1 %v207_v41, %s1415_s18 }
 0x26f   :  { %v210_v44 = vpop.permute.xlu1 %209 }
 0x270   :  { %1215 = vmatmul.msk.f32.vlgmr.msra.gmra.mxu3 %vm146_vm6, %v210_v44  ;;  %v212_v45 = vsel %vm146_vm6, %v210_v44, 0.0 }
 0x271   :  { %1213 = vmatmul.msk.f32.vlgmr.msra.gmra.mxu2 %vm213_vm7, %v212_v45  ;;  %546 = vmatpush.msra.mxu3 %v1468_v1 }
 0x272   :  { %741 = vmatpush.msra.mxu2 %v1510_v33 }
 0x273   :  { %547 = vmatpush.msra.mxu3 %v1470_v2 }
 0x274   :  { %742 = vmatpush.msra.mxu2 %v1515_v34 }
 0x275   :  { %548 = vmatpush.msra.mxu3 %v1479_v5 }
 0x276   :  { %743 = vmatpush.msra.mxu2 %v1522_v35 }
 0x277   :  { %549 = vmatpush.msra.mxu3 %v1484_v6 }
 0x278   :  { %744 = vmatpush.msra.mxu2 %v1530_v36 }
 0x27a   :  { %745 = vmatpush.msra.mxu2 %v1538_v37 }
 0x27c   :  { %746 = vmatpush.msra.mxu2 %v1546_v38 }
 0x27e   :  { %747 = vmatpush.msra.mxu2 %v1554_v39 }
 0x280   :  { %748 = vmatpush.msra.mxu2 %v1567_v42 }
 0x2f3   :  { %v293_v48 = vpop.f32.mrf.mxu3 }
 0x2f4   :  { %v296_v49 = vadd.f32 %v293_v48, %v110_v47  ;;  %v234_v51 = vpop.f32.mrf.mxu2 }
 0x2f5   :  { %v235_v52 = vadd.f32 %v1611_v50, %v234_v51  ;;  %v112_v51 = vpop.f32.mrf.mxu0 }
 0x2f6   :  { %1262 = vtanh.f32 %v296_v49  ;;  %v1216_v55 = vmul.f32 -1.442695, %v296_v49 }
 0x2f7   :  { %1264 = vtanh.f32 %v235_v52  ;;  %v1214_v56 = vmul.f32 -1.442695, %v235_v52  ;;  %v113_v52 = vadd.f32 %v1498_v8, %v112_v51 }
 0x2f8   :  { %1266 = vpow2.f32 %v1216_v55 }
 0x2f9   :  { %1268 = vpow2.f32 %v1214_v56 }
 0x2fc   :  { %v1263_v53 = vpop.eup %1262 }
 0x2fd   :  { %319 = vrot.lane.b32.xlu2 %v1263_v53, %s1414_s17  ;;  %v1265_v54 = vpop.eup %1264 }
 0x2fe   :  { %v1267_v57 = vpop.eup %1266 }
 0x2ff   :  { %v300_v58 = vadd.f32 1.0, %v1267_v57  ;;  %v1269_v59 = vpop.eup %1268 }
 0x300   :  { %v240_v60 = vadd.f32 1.0, %v1269_v59 }
 0x301   :  { %1270 = vrcp.f32 %v300_v58  ;;  %v312_v10 = vand.u32 2147483648, %v300_v58  ;;  %vm306_vm9 = vweird.f32 %v300_v58  ;;  %v310_v11 = vand.u32 2147483647, %v300_v58 }
 0x302   :  { %1272 = vrcp.f32 %v240_v60  ;;  %v252_v19 = vand.u32 2147483648, %v240_v60  ;;  %vm246_vm13 = vweird.f32 %v240_v60  ;;  %v250_v20 = vand.u32 2147483647, %v240_v60 }
 0x303   :  { %v313_v14 = vor.u32 1.1754944e-38, %v312_v10  ;;  %vm311_vm11 = vcmp.eq.f32.partialorder %v310_v11, 8.507059e+37 }
 0x304   :  { %v253_v22 = vor.u32 1.1754944e-38, %v252_v19  ;;  %vm251_vm15 = vcmp.eq.f32.partialorder %v250_v20, 8.507059e+37 }
 0x305   :  { %259 = vrot.lane.b32.xlu2 %v1265_v54, %s1414_s17 }
 0x307   :  { %v1271_v61 = vpop.eup %1270 }
 0x308   :  { %v302_v62 = vmul.f32 %v1271_v61, %v300_v58  ;;  %v1273_v0 = vpop.eup %1272  ;;  %vm307_vm8 = vweird.f32 %v1271_v61 }
 0x309   :  { %v242_v4 = vmul.f32 %v1273_v0, %v240_v60  ;;  %vm308_vm10 = vmor %vm306_vm9, %vm307_vm8  ;;  %vm247_vm12 = vweird.f32 %v1273_v0 }
 0x30a   :  { %v303_v63 = vsub.f32 1.0, %v302_v62  ;;  %vm248_vm14 = vmor %vm246_vm13, %vm247_vm12 }
 0x30b   :  { %v243_v9 = vsub.f32 1.0, %v242_v4 }
 0x30c   :  { %v304_v3 = vmul.f32 %v1271_v61, %v303_v63 }
 0x30d   :  { %v244_v13 = vmul.f32 %v1273_v0, %v243_v9 }
 0x30e   :  { %v305_v7 = vadd.f32 %v1271_v61, %v304_v3 }
 0x30f   :  { %v245_v18 = vadd.f32 %v1273_v0, %v244_v13 }
 0x310   :  { %v309_v12 = vsel %vm308_vm10, %v1271_v61, %v305_v7 }
 0x311   :  { %v314_v16 = vsel %vm311_vm11, %v313_v14, %v309_v12  ;;  %v249_v21 = vsel %vm248_vm14, %v1273_v0, %v245_v18 }
 0x312   :  { %v254_v24 = vsel %vm251_vm15, %v253_v22, %v249_v21  ;;  %v317_v26 = vmul.f32 %v314_v16, %v1503_v31 }
 0x313   :  { %v257_v29 = vmul.f32 0.0, %v254_v24 }
 0x357   :  { %v320_v15 = vpop.permute.xlu2 %319 }
 0x358   :  { %v322_v17 = vmul.f32 %v320_v15, %v314_v16 }
 0x35a   :  { %324 = vrot.lane.b32.xlu0 %v322_v17, %s1415_s18 }
 0x35f   :  { %v260_v23 = vpop.permute.xlu2 %259 }
 0x360   :  { %v262_v25 = vmul.f32 %v260_v23, %v254_v24 }
 0x362   :  { %264 = vrot.lane.b32.xlu1 %v262_v25, %s1415_s18 }
 0x3cc   :  { %v325_v27 = vpop.permute.xlu0 %324 }
 0x3cd   :  { %v1619_v28 = vadd.f32 %v325_v27, %v317_v26 }
 0x3cf   :  { %1274 = vtanh.f32 %v1619_v28 }
 0x3d4   :  { %v265_v30 = vpop.permute.xlu1 %264 }
 0x3d5   :  { %v1275_v32 = vpop.eup %1274  ;;  %v1622_v40 = vadd.f32 %v265_v30, %v257_v29 }
 0x3d6   :  { %330 = vrot.lane.b32.xlu2 %v1275_v32, %s1414_s17 }
 0x3d7   :  { %1276 = vtanh.f32 %v1622_v40 }
 0x3dd   :  { %v1277_v41 = vpop.eup %1276 }
 0x3de   :  { %270 = vrot.lane.b32.xlu0 %v1277_v41, %s1414_s17 }
 0x430   :  { %v331_v43 = vpop.permute.xlu2 %330 }
 0x431   :  { %v333_v44 = vmul.f32 %v331_v43, %v314_v16 }
 0x433   :  { %335 = vrot.lane.b32.xlu1 %v333_v44, %s1415_s18 }
 0x450   :  { %v271_v31 = vpop.permute.xlu0 %270 }
 0x451   :  { %v273_v45 = vmul.f32 %v271_v31, %v254_v24 }
 0x453   :  { %339 = vrot.lane.b32.xlu2 %v273_v45, %s1414_s17 }
 0x4a5   :  { %v336_v47 = vpop.permute.xlu1 %335 }
 0x4a6   :  { %1219 = vmatmul.msk.f32.vlgmr.msrb.gmra.mxu3 %vm146_vm6, %v336_v47 }
 0x4a7   :  { %675 = vmatpush.msrb.mxu3 %v1468_v1 }
 0x4a9   :  { %676 = vmatpush.msrb.mxu3 %v1470_v2 }
 0x4ab   :  { %677 = vmatpush.msrb.mxu3 %v1479_v5 }
 0x4ad   :  { %v340_v48 = vpop.permute.xlu2 %339  ;;  %678 = vmatpush.msrb.mxu3 %v1484_v6 }
 0x4ae   :  { %v342_v49 = vsel %vm146_vm6, %v336_v47, %v340_v48 }
 0x4af   :  { %1217 = vmatmul.msk.f32.vlgmr.msrb.gmra.mxu1 %vm213_vm7, %v342_v49 }
 0x4b0   :  { %870 = vmatpush.msrb.mxu1 %v1510_v33 }
 0x4b2   :  { %871 = vmatpush.msrb.mxu1 %v1515_v34 }
 0x4b4   :  { %872 = vmatpush.msrb.mxu1 %v1522_v35 }
 0x4b6   :  { %873 = vmatpush.msrb.mxu1 %v1530_v36 }
 0x4b8   :  { %874 = vmatpush.msrb.mxu1 %v1538_v37 }
 0x4ba   :  { %875 = vmatpush.msrb.mxu1 %v1546_v38 }
 0x4bc   :  { %876 = vmatpush.msrb.mxu1 %v1554_v39 }
 0x4be   :  { %877 = vmatpush.msrb.mxu1 %v1567_v42 }
 0x529   :  { %v422_v53 = vpop.f32.mrf.mxu3 }
 0x52a   :  { %v425_v54 = vadd.f32 %v422_v53, %v113_v52 }
 0x52c   :  { %1278 = vtanh.f32 %v425_v54  ;;  %v363_v55 = vpop.f32.mrf.mxu1  ;;  %v1220_v59 = vmul.f32 -1.442695, %v425_v54 }
 0x52d   :  { %v364_v56 = vadd.f32 %v1611_v50, %v363_v55 }
 0x52f   :  { %1280 = vtanh.f32 %v364_v56  ;;  %v1218_v60 = vmul.f32 -1.442695, %v364_v56 }
 0x530   :  { %1282 = vpow2.f32 %v1220_v59 }
 0x531   :  { %1284 = vpow2.f32 %v1218_v60 }
 0x532   :  { %v1279_v57 = vpop.eup %1278 }
 0x533   :  { %448 = vrot.lane.b32.xlu0 %v1279_v57, %s1414_s17 }
 0x535   :  { %v1281_v58 = vpop.eup %1280 }
 0x536   :  { %388 = vrot.lane.b32.xlu1 %v1281_v58, %s1414_s17  ;;  %v1283_v61 = vpop.eup %1282 }
 0x537   :  { %v1285_v62 = vpop.eup %1284  ;;  %v429_v63 = vadd.f32 1.0, %v1283_v61 }
 0x538   :  { %v369_v0 = vadd.f32 1.0, %v1285_v62 }
 0x539   :  { %1286 = vrcp.f32 %v429_v63  ;;  %v441_v15 = vand.u32 2147483648, %v429_v63  ;;  %vm435_vm2 = vweird.f32 %v429_v63  ;;  %v439_v16 = vand.u32 2147483647, %v429_v63 }
 0x53a   :  { %1288 = vrcp.f32 %v369_v0  ;;  %v381_v19 = vand.u32 2147483648, %v369_v0  ;;  %vm375_vm5 = vweird.f32 %v369_v0  ;;  %v379_v21 = vand.u32 2147483647, %v369_v0 }
 0x53b   :  { %v442_v20 = vor.u32 1.1754944e-38, %v441_v15  ;;  %vm440_vm8 = vcmp.eq.f32.partialorder %v439_v16, 8.507059e+37 }
 0x53c   :  { %v382_v26 = vor.u32 1.1754944e-38, %v381_v19  ;;  %vm380_vm10 = vcmp.eq.f32.partialorder %v379_v21, 8.507059e+37 }
 0x53f   :  { %v1287_v3 = vpop.eup %1286 }
 0x540   :  { %v1289_v4 = vpop.eup %1288  ;;  %v431_v7 = vmul.f32 %v1287_v3, %v429_v63  ;;  %vm436_vm0 = vweird.f32 %v1287_v3 }
 0x541   :  { %v371_v9 = vmul.f32 %v1289_v4, %v369_v0  ;;  %vm437_vm3 = vmor %vm435_vm2, %vm436_vm0  ;;  %vm376_vm4 = vweird.f32 %v1289_v4 }
 0x542   :  { %v432_v10 = vsub.f32 1.0, %v431_v7  ;;  %vm377_vm9 = vmor %vm375_vm5, %vm376_vm4 }
 0x543   :  { %v372_v11 = vsub.f32 1.0, %v371_v9 }
 0x544   :  { %v433_v12 = vmul.f32 %v1287_v3, %v432_v10 }
 0x545   :  { %v373_v13 = vmul.f32 %v1289_v4, %v372_v11 }
 0x546   :  { %v434_v14 = vadd.f32 %v1287_v3, %v433_v12 }
 0x547   :  { %v374_v17 = vadd.f32 %v1289_v4, %v373_v13 }
 0x548   :  { %v438_v18 = vsel %vm437_vm3, %v1287_v3, %v434_v14 }
 0x549   :  { %v443_v22 = vsel %vm440_vm8, %v442_v20, %v438_v18  ;;  %v378_v24 = vsel %vm377_vm9, %v1289_v4, %v374_v17 }
 0x54a   :  { %v383_v29 = vsel %vm380_vm10, %v382_v26, %v378_v24  ;;  %v446_v32 = vmul.f32 %v443_v22, %v1619_v28 }
 0x54b   :  { %v386_v31 = vmul.f32 %v383_v29, %v1622_v40  ;;  %v50_v40 = vld [vmem:[%s1829_s0 + $0x18] sm:$0xff] }
 0x54c   :  { %1207 = vmatmul.msk.f32.gmra.mxu0 %vm60_vm1, %v50_v40 }
 0x5a5   :  { %v449_v23 = vpop.permute.xlu0 %448 }
 0x5a6   :  { %v451_v25 = vmul.f32 %v449_v23, %v443_v22 }
 0x5a8   :  { %v389_v27 = vpop.permute.xlu1 %388  ;;  %453 = vrot.lane.b32.xlu2 %v451_v25, %s1415_s18 }
 0x5a9   :  { %v391_v30 = vmul.f32 %v389_v27, %v383_v29 }
 0x5ab   :  { %393 = vrot.lane.b32.xlu0 %v391_v30, %s1415_s18 }
 0x5c9   :  { %v115_v55 = vpop.f32.mrf.mxu0 }
 0x5ca   :  { %v116_v56 = vadd.f32 %v1498_v8, %v115_v55 }
 0x602   :  { %v454_v41 = vpop.permute.xlu2 %453 }
 0x603   :  { %v1655_v43 = vadd.f32 %v454_v41, %v446_v32 }
 0x605   :  { %1290 = vtanh.f32 %v1655_v43 }
 0x60b   :  { %v1291_v44 = vpop.eup %1290 }
 0x60c   :  { %459 = vrot.lane.b32.xlu1 %v1291_v44, %s1414_s17 }
 0x61d   :  { %v394_v45 = vpop.permute.xlu0 %393 }
 0x61e   :  { %v1660_v46 = vadd.f32 %v394_v45, %v386_v31 }
 0x620   :  { %1292 = vtanh.f32 %v1660_v46 }
 0x626   :  { %v1293_v47 = vpop.eup %1292 }
 0x627   :  { %399 = vrot.lane.b32.xlu2 %v1293_v47, %s1414_s17 }
 0x67e   :  { %v460_v48 = vpop.permute.xlu1 %459 }
 0x67f   :  { %v462_v28 = vmul.f32 %v460_v48, %v443_v22 }
 0x681   :  { %464 = vrot.lane.b32.xlu0 %v462_v28, %s1415_s18  ;;  %v400_v49 = vpop.permute.xlu2 %399 }
 0x682   :  { %v402_v51 = vmul.f32 %v400_v49, %v383_v29 }
 0x684   :  { %468 = vrot.lane.b32.xlu1 %v402_v51, %s1414_s17 }
 0x6f3   :  { %v465_v52 = vpop.permute.xlu0 %464 }
 0x6f4   :  { %1223 = vmatmul.msk.f32.vlgmr.msra.gmra.mxu3 %vm146_vm6, %v465_v52 }
 0x6f5   :  { %804 = vmatpush.msra.mxu3 %v1468_v1 }
 0x6f6   :  { %v469_v53 = vpop.permute.xlu1 %468 }
 0x6f7   :  { %v471_v54 = vsel %vm146_vm6, %v465_v52, %v469_v53  ;;  %805 = vmatpush.msra.mxu3 %v1470_v2 }
 0x6f8   :  { %1221 = vmatmul.msk.f32.vlgmr.msrb.gmra.mxu2 %vm213_vm7, %v471_v54 }
 0x6f9   :  { %806 = vmatpush.msra.mxu3 %v1479_v5  ;;  %999 = vmatpush.msrb.mxu2 %v1510_v33 }
 0x6fb   :  { %807 = vmatpush.msra.mxu3 %v1484_v6  ;;  %1000 = vmatpush.msrb.mxu2 %v1515_v34 }
 0x6fd   :  { %1001 = vmatpush.msrb.mxu2 %v1522_v35 }
 0x6ff   :  { %1002 = vmatpush.msrb.mxu2 %v1530_v36 }
 0x701   :  { %1003 = vmatpush.msrb.mxu2 %v1538_v37 }
 0x703   :  { %1004 = vmatpush.msrb.mxu2 %v1546_v38 }
 0x705   :  { %1005 = vmatpush.msrb.mxu2 %v1554_v39 }
 0x707   :  { %1006 = vmatpush.msrb.mxu2 %v1567_v42 }
 0x777   :  { %v551_v33 = vpop.f32.mrf.mxu3 }
 0x778   :  { %v554_v57 = vadd.f32 %v551_v33, %v116_v56 }
 0x77a   :  { %1294 = vtanh.f32 %v554_v57  ;;  %v1224_v37 = vmul.f32 -1.442695, %v554_v57 }
 0x77b   :  { %v492_v58 = vpop.f32.mrf.mxu2 }
 0x77c   :  { %v493_v34 = vadd.f32 %v1611_v50, %v492_v58 }
 0x77e   :  { %1296 = vtanh.f32 %v493_v34  ;;  %v1222_v60 = vmul.f32 -1.442695, %v493_v34 }
 0x77f   :  { %1298 = vpow2.f32 %v1224_v37 }
 0x780   :  { %v1295_v35 = vpop.eup %1294 }
 0x781   :  { %577 = vrot.lane.b32.xlu2 %v1295_v35, %s1414_s17 }
 0x784   :  { %v1297_v36 = vpop.eup %1296 }
 0x785   :  { %517 = vrot.lane.b32.xlu0 %v1297_v36, %s1414_s17  ;;  %v1299_v38 = vpop.eup %1298 }
 0x786   :  { %v558_v39 = vadd.f32 1.0, %v1299_v38 }
 0x788   :  { %1300 = vrcp.f32 %v558_v39  ;;  %v570_v3 = vand.u32 2147483648, %v558_v39  ;;  %vm564_vm12 = vweird.f32 %v558_v39  ;;  %v568_v4 = vand.u32 2147483647, %v558_v39 }
 0x789   :  { %1302 = vpow2.f32 %v1222_v60 }
 0x78a   :  { %v571_v10 = vor.u32 1.1754944e-38, %v570_v3  ;;  %vm569_vm14 = vcmp.eq.f32.partialorder %v568_v4, 8.507059e+37 }
 0x78e   :  { %v1301_v42 = vpop.eup %1300 }
 0x78f   :  { %v560_v59 = vmul.f32 %v1301_v42, %v558_v39  ;;  %v1303_v63 = vpop.eup %1302  ;;  %vm565_vm11 = vweird.f32 %v1301_v42 }
 0x790   :  { %v498_v7 = vadd.f32 1.0, %v1303_v63  ;;  %vm566_vm13 = vmor %vm564_vm12, %vm565_vm11 }
 0x791   :  { %v561_v61 = vsub.f32 1.0, %v560_v59 }
 0x792   :  { %1304 = vrcp.f32 %v498_v7  ;;  %v510_v19 = vand.u32 2147483648, %v498_v7  ;;  %vm504_vm0 = vweird.f32 %v498_v7  ;;  %v508_v20 = vand.u32 2147483647, %v498_v7 }
 0x793   :  { %v562_v62 = vmul.f32 %v1301_v42, %v561_v61 }
 0x794   :  { %v511_v22 = vor.u32 1.1754944e-38, %v510_v19  ;;  %vm509_vm3 = vcmp.eq.f32.partialorder %v508_v20, 8.507059e+37 }
 0x795   :  { %v563_v0 = vadd.f32 %v1301_v42, %v562_v62 }
 0x797   :  { %v567_v9 = vsel %vm566_vm13, %v1301_v42, %v563_v0 }
 0x798   :  { %v572_v12 = vsel %vm569_vm14, %v571_v10, %v567_v9  ;;  %v1305_v14 = vpop.eup %1304 }
 0x799   :  { %v500_v15 = vmul.f32 %v1305_v14, %v498_v7  ;;  %vm505_vm15 = vweird.f32 %v1305_v14  ;;  %v575_v26 = vmul.f32 %v572_v12, %v1655_v43 }
 0x79a   :  { %vm506_vm2 = vmor %vm504_vm0, %vm505_vm15 }
 0x79b   :  { %v501_v16 = vsub.f32 1.0, %v500_v15 }
 0x79d   :  { %v502_v17 = vmul.f32 %v1305_v14, %v501_v16 }
 0x79f   :  { %v503_v18 = vadd.f32 %v1305_v14, %v502_v17 }
 0x7a1   :  { %v507_v21 = vsel %vm506_vm2, %v1305_v14, %v503_v18 }
 0x7a2   :  { %v512_v24 = vsel %vm509_vm3, %v511_v22, %v507_v21 }
 0x7a3   :  { %v515_v30 = vmul.f32 %v512_v24, %v1660_v46  ;;  %v51_v46 = vld [vmem:[%s1829_s0 + $0x20] sm:$0xff] }
 0x7a4   :  { %1208 = vmatmul.msk.f32.gmra.mxu0 %vm60_vm1, %v51_v46 }
 0x7db   :  { %v578_v11 = vpop.permute.xlu2 %577 }
 0x7dc   :  { %v580_v13 = vmul.f32 %v578_v11, %v572_v12 }
 0x7de   :  { %582 = vrot.lane.b32.xlu1 %v580_v13, %s1415_s18 }
 0x7f7   :  { %v518_v23 = vpop.permute.xlu0 %517 }
 0x7f8   :  { %v520_v25 = vmul.f32 %v518_v23, %v512_v24 }
 0x7fa   :  { %522 = vrot.lane.b32.xlu2 %v520_v25, %s1415_s18 }
 0x821   :  { %v118_v40 = vpop.f32.mrf.mxu0 }
 0x822   :  { %v119_v52 = vadd.f32 %v1498_v8, %v118_v40 }
 0x850   :  { %v583_v27 = vpop.permute.xlu1 %582 }
 0x851   :  { %v1692_v29 = vadd.f32 %v583_v27, %v575_v26 }
 0x853   :  { %1306 = vtanh.f32 %v1692_v29 }
 0x854   :  { %v523_v32 = vpop.permute.xlu2 %522 }
 0x855   :  { %v1696_v41 = vadd.f32 %v523_v32, %v515_v30 }
 0x857   :  { %1308 = vtanh.f32 %v1696_v41 }
 0x859   :  { %v1307_v44 = vpop.eup %1306 }
 0x85a   :  { %588 = vrot.lane.b32.xlu0 %v1307_v44, %s1414_s17 }
 0x85d   :  { %v1309_v31 = vpop.eup %1308 }
 0x85e   :  { %528 = vrot.lane.b32.xlu1 %v1309_v31, %s1414_s17 }
 0x8cc   :  { %v589_v45 = vpop.permute.xlu0 %588 }
 0x8cd   :  { %v591_v43 = vmul.f32 %v589_v45, %v572_v12  ;;  %v52_v45 = vld [vmem:[%s1829_s0 + $0x28] sm:$0xff] }
 0x8ce   :  { %1209 = vmatmul.msk.f32.gmra.mxu0 %vm60_vm1, %v52_v45 }
 0x8cf   :  { %593 = vrot.lane.b32.xlu2 %v591_v43, %s1415_s18 }
 0x8d0   :  { %v529_v47 = vpop.permute.xlu1 %528 }
 0x8d1   :  { %v531_v48 = vmul.f32 %v529_v47, %v512_v24 }
 0x8d3   :  { %597 = vrot.lane.b32.xlu0 %v531_v48, %s1414_s17 }
 0x929   :  { %v594_v28 = vpop.permute.xlu2 %593 }
 0x92a   :  { %1227 = vmatmul.msk.f32.vlgmr.msrb.gmra.mxu3 %vm146_vm6, %v594_v28 }
 0x92b   :  { %933 = vmatpush.msrb.mxu3 %v1468_v1 }
 0x92d   :  { %934 = vmatpush.msrb.mxu3 %v1470_v2 }
 0x92f   :  { %935 = vmatpush.msrb.mxu3 %v1479_v5 }
 0x931   :  { %936 = vmatpush.msrb.mxu3 %v1484_v6 }
 0x945   :  { %v598_v49 = vpop.permute.xlu0 %597 }
 0x946   :  { %v600_v51 = vsel %vm146_vm6, %v594_v28, %v598_v49 }
 0x947   :  { %1225 = vmatmul.msk.f32.vlgmr.msra.gmra.mxu1 %vm213_vm7, %v600_v51 }
 0x94b   :  { %v121_v46 = vpop.f32.mrf.mxu0 }
 0x94c   :  { %v122_v28 = vadd.f32 %v1498_v8, %v121_v46 }
 0x9ad   :  { %v680_v53 = vpop.f32.mrf.mxu3 }
 0x9ae   :  { %v683_v54 = vadd.f32 %v680_v53, %v119_v52 }
 0x9b0   :  { %1310 = vtanh.f32 %v683_v54  ;;  %v1228_v34 = vmul.f32 -1.442695, %v683_v54 }
 0x9b6   :  { %v1311_v55 = vpop.eup %1310 }
 0x9b7   :  { %706 = vrot.lane.b32.xlu1 %v1311_v55, %s1414_s17 }
 0x9c4   :  { %v621_v56 = vpop.f32.mrf.mxu1 }
 0x9c5   :  { %v622_v33 = vadd.f32 %v1611_v50, %v621_v56 }
 0x9c7   :  { %1312 = vtanh.f32 %v622_v33  ;;  %v1226_v58 = vmul.f32 -1.442695, %v622_v33 }
 0x9c9   :  { %1314 = vpow2.f32 %v1226_v58 }
 0x9ca   :  { %1316 = vpow2.f32 %v1228_v34 }
 0x9cd   :  { %v1313_v57 = vpop.eup %1312 }
 0x9ce   :  { %646 = vrot.lane.b32.xlu2 %v1313_v57, %s1414_s17 }
 0x9cf   :  { %v1315_v35 = vpop.eup %1314 }
 0x9d0   :  { %v1317_v36 = vpop.eup %1316  ;;  %v627_v37 = vadd.f32 1.0, %v1315_v35 }
 0x9d1   :  { %v687_v38 = vadd.f32 1.0, %v1317_v36 }
 0x9d2   :  { %1318 = vrcp.f32 %v627_v37  ;;  %v639_v4 = vand.u32 2147483648, %v627_v37  ;;  %vm633_vm8 = vweird.f32 %v627_v37  ;;  %v637_v9 = vand.u32 2147483647, %v627_v37 }
 0x9d3   :  { %1320 = vrcp.f32 %v687_v38  ;;  %v699_v10 = vand.u32 2147483648, %v687_v38  ;;  %vm693_vm10 = vweird.f32 %v687_v38  ;;  %v697_v11 = vand.u32 2147483647, %v687_v38 }
 0x9d4   :  { %v640_v13 = vor.u32 1.1754944e-38, %v639_v4  ;;  %vm638_vm12 = vcmp.eq.f32.partialorder %v637_v9, 8.507059e+37 }
 0x9d5   :  { %v700_v15 = vor.u32 1.1754944e-38, %v699_v10  ;;  %vm698_vm13 = vcmp.eq.f32.partialorder %v697_v11, 8.507059e+37 }
 0x9d8   :  { %v1319_v39 = vpop.eup %1318 }
 0x9d9   :  { %v1321_v42 = vpop.eup %1320  ;;  %v629_v59 = vmul.f32 %v1319_v39, %v627_v37  ;;  %vm634_vm4 = vweird.f32 %v1319_v39 }
 0x9da   :  { %v689_v60 = vmul.f32 %v1321_v42, %v687_v38  ;;  %vm694_vm5 = vweird.f32 %v1321_v42  ;;  %vm635_vm9 = vmor %vm633_vm8, %vm634_vm4 }
 0x9db   :  { %v630_v61 = vsub.f32 1.0, %v629_v59  ;;  %vm695_vm11 = vmor %vm693_vm10, %vm694_vm5 }
 0x9dc   :  { %v690_v62 = vsub.f32 1.0, %v689_v60 }
 0x9dd   :  { %v631_v63 = vmul.f32 %v1319_v39, %v630_v61 }
 0x9de   :  { %v691_v0 = vmul.f32 %v1321_v42, %v690_v62 }
 0x9df   :  { %v632_v3 = vadd.f32 %v1319_v39, %v631_v63 }
 0x9e0   :  { %v692_v7 = vadd.f32 %v1321_v42, %v691_v0 }
 0x9e1   :  { %v636_v12 = vsel %vm635_vm9, %v1319_v39, %v632_v3 }
 0x9e2   :  { %v696_v14 = vsel %vm695_vm11, %v1321_v42, %v692_v7  ;;  %v641_v17 = vsel %vm638_vm12, %v640_v13, %v636_v12 }
 0x9e3   :  { %v701_v19 = vsel %vm698_vm13, %v700_v15, %v696_v14  ;;  %v644_v22 = vmul.f32 %v641_v17, %v1696_v41 }
 0x9e4   :  { %v704_v24 = vmul.f32 %v701_v19, %v1692_v29 }
 0xa28   :  { %v647_v16 = vpop.permute.xlu2 %646 }
 0xa29   :  { %v649_v18 = vmul.f32 %v647_v16, %v641_v17  ;;  %v707_v20 = vpop.permute.xlu1 %706 }
 0xa2a   :  { %v709_v21 = vmul.f32 %v707_v20, %v701_v19 }
 0xa2b   :  { %651 = vrot.lane.b32.xlu1 %v649_v18, %s1415_s18 }
 0xa2c   :  { %711 = vrot.lane.b32.xlu0 %v709_v21, %s1415_s18 }
 0xa9d   :  { %v652_v23 = vpop.permute.xlu1 %651 }
 0xa9e   :  { %v1722_v25 = vadd.f32 %v652_v23, %v644_v22  ;;  %v712_v26 = vpop.permute.xlu0 %711 }
 0xa9f   :  { %v1724_v27 = vadd.f32 %v712_v26, %v704_v24 }
 0xaa0   :  { %1322 = vtanh.f32 %v1722_v25 }
 0xaa1   :  { %1324 = vtanh.f32 %v1724_v27 }
 0xaa6   :  { %v1323_v30 = vpop.eup %1322 }
 0xaa7   :  { %v1325_v32 = vpop.eup %1324  ;;  %657 = vrot.lane.b32.xlu0 %v1323_v30, %s1414_s17 }
 0xaa8   :  { %717 = vrot.lane.b32.xlu2 %v1325_v32, %s1414_s17 }
 0xb02   :  { %v718_v44 = vpop.permute.xlu2 %717 }
 0xb03   :  { %v720_v41 = vmul.f32 %v718_v44, %v701_v19 }
 0xb05   :  { %722 = vrot.lane.b32.xlu1 %v720_v41, %s1415_s18 }
 0xb19   :  { %v658_v29 = vpop.permute.xlu0 %657 }
 0xb1a   :  { %v660_v31 = vmul.f32 %v658_v29, %v641_v17  ;;  %v1772_v29 = vld [vmem:[%s1831_s2] ss:$0 sm:$0xff] }
 0xb1c   :  { %726 = vrot.lane.b32.xlu2 %v660_v31, %s1414_s17 }
 0xb76   :  { %v727_v43 = vpop.permute.xlu2 %726 }
 0xb77   :  { %v723_v47 = vpop.permute.xlu1 %722 }
 0xb78   :  { %v729_v48 = vsel %vm146_vm6, %v723_v47, %v727_v43  ;;  %1231 = vmatmul.msk.f32.vlgmr.msra.gmra.mxu3 %vm146_vm6, %v723_v47 }
 0xb79   :  { %1229 = vmatmul.msk.f32.vlgmr.msra.gmra.mxu2 %vm213_vm7, %v729_v48  ;;  %1062 = vmatpush.msra.mxu3 %v1468_v1 }
 0xb7b   :  { %1063 = vmatpush.msra.mxu3 %v1470_v2 }
 0xb7d   :  { %1064 = vmatpush.msra.mxu3 %v1479_v5 }
 0xb7f   :  { %1065 = vmatpush.msra.mxu3 %v1484_v6 }
 0xbfb   :  { %v809_v49 = vpop.f32.mrf.mxu3 }
 0xbfc   :  { %v812_v51 = vadd.f32 %v809_v49, %v122_v28  ;;  %v750_v40 = vpop.f32.mrf.mxu2 }
 0xbfd   :  { %v751_v52 = vadd.f32 %v1611_v50, %v750_v40 }
 0xbfe   :  { %1326 = vtanh.f32 %v812_v51  ;;  %v1232_v1 = vmul.f32 -1.442695, %v812_v51 }
 0xbff   :  { %1328 = vtanh.f32 %v751_v52  ;;  %v1230_v2 = vmul.f32 -1.442695, %v751_v52 }
 0xc00   :  { %1330 = vpow2.f32 %v1232_v1 }
 0xc01   :  { %1332 = vpow2.f32 %v1230_v2 }
 0xc04   :  { %v1327_v53 = vpop.eup %1326 }
 0xc05   :  { %v1329_v54 = vpop.eup %1328  ;;  %835 = vrot.lane.b32.xlu0 %v1327_v53, %s1414_s17 }
 0xc06   :  { %775 = vrot.lane.b32.xlu1 %v1329_v54, %s1414_s17  ;;  %v1331_v5 = vpop.eup %1330 }
 0xc07   :  { %v1333_v6 = vpop.eup %1332  ;;  %v816_v8 = vadd.f32 1.0, %v1331_v5 }
 0xc08   :  { %v756_v55 = vadd.f32 1.0, %v1333_v6 }
 0xc09   :  { %1334 = vrcp.f32 %v816_v8  ;;  %v828_v39 = vand.u32 2147483648, %v816_v8  ;;  %vm822_vm0 = vweird.f32 %v816_v8  ;;  %v826_v59 = vand.u32 2147483647, %v816_v8 }
 0xc0a   :  { %1336 = vrcp.f32 %v756_v55  ;;  %v768_v60 = vand.u32 2147483648, %v756_v55  ;;  %vm762_vm3 = vweird.f32 %v756_v55  ;;  %v766_v61 = vand.u32 2147483647, %v756_v55 }
 0xc0b   :  { %v829_v63 = vor.u32 1.1754944e-38, %v828_v39  ;;  %vm827_vm5 = vcmp.eq.f32.partialorder %v826_v59, 8.507059e+37 }
 0xc0c   :  { %v769_v3 = vor.u32 1.1754944e-38, %v768_v60  ;;  %vm767_vm8 = vcmp.eq.f32.partialorder %v766_v61, 8.507059e+37 }
 0xc0f   :  { %v1335_v56 = vpop.eup %1334 }
 0xc10   :  { %v1337_v33 = vpop.eup %1336  ;;  %v818_v57 = vmul.f32 %v1335_v56, %v816_v8  ;;  %vm823_vm14 = vweird.f32 %v1335_v56 }
 0xc11   :  { %v758_v58 = vmul.f32 %v1337_v33, %v756_v55  ;;  %vm763_vm15 = vweird.f32 %v1337_v33  ;;  %vm824_vm2 = vmor %vm822_vm0, %vm823_vm14 }
 0xc12   :  { %v819_v34 = vsub.f32 1.0, %v818_v57  ;;  %vm764_vm4 = vmor %vm762_vm3, %vm763_vm15 }
 0xc13   :  { %v759_v35 = vsub.f32 1.0, %v758_v58 }
 0xc14   :  { %v820_v36 = vmul.f32 %v1335_v56, %v819_v34 }
 0xc15   :  { %v760_v37 = vmul.f32 %v1337_v33, %v759_v35 }
 0xc16   :  { %v821_v38 = vadd.f32 %v1335_v56, %v820_v36 }
 0xc17   :  { %v761_v42 = vadd.f32 %v1337_v33, %v760_v37 }
 0xc18   :  { %v825_v62 = vsel %vm824_vm2, %v1335_v56, %v821_v38 }
 0xc19   :  { %v765_v0 = vsel %vm764_vm4, %v1337_v33, %v761_v42  ;;  %v830_v7 = vsel %vm827_vm5, %v829_v63, %v825_v62 }
 0xc1a   :  { %v770_v11 = vsel %vm767_vm8, %v769_v3, %v765_v0  ;;  %v833_v13 = vmul.f32 %v830_v7, %v1724_v27 }
 0xc1b   :  { %v773_v17 = vmul.f32 %v770_v11, %v1722_v25  ;;  %v53_v25 = vld [vmem:[%s1829_s0 + $0x30] sm:$0xff] }
 0xc1c   :  { %1210 = vmatmul.msk.f32.gmra.mxu0 %vm60_vm1, %v53_v25 }
 0xc77   :  { %v836_v4 = vpop.permute.xlu0 %835 }
 0xc78   :  { %v838_v9 = vmul.f32 %v836_v4, %v830_v7  ;;  %v776_v10 = vpop.permute.xlu1 %775 }
 0xc79   :  { %v778_v12 = vmul.f32 %v776_v10, %v770_v11 }
 0xc7a   :  { %840 = vrot.lane.b32.xlu2 %v838_v9, %s1415_s18 }
 0xc7b   :  { %780 = vrot.lane.b32.xlu0 %v778_v12, %s1415_s18 }
 0xc99   :  { %v124_v32 = vpop.f32.mrf.mxu0 }
 0xc9a   :  { %v125_v31 = vadd.f32 %v1772_v29, %v124_v32 }
 0xcd4   :  { %v841_v14 = vpop.permute.xlu2 %840 }
 0xcd5   :  { %v1750_v15 = vadd.f32 %v841_v14, %v833_v13 }
 0xcd7   :  { %1338 = vtanh.f32 %v1750_v15 }
 0xcdd   :  { %v1339_v16 = vpop.eup %1338 }
 0xcde   :  { %846 = vrot.lane.b32.xlu1 %v1339_v16, %s1414_s17 }
 0xced   :  { %v781_v18 = vpop.permute.xlu0 %780 }
 0xcee   :  { %v1755_v19 = vadd.f32 %v781_v18, %v773_v17 }
 0xcf0   :  { %1340 = vtanh.f32 %v1755_v19 }
 0xcf6   :  { %v1341_v20 = vpop.eup %1340 }
 0xcf7   :  { %786 = vrot.lane.b32.xlu2 %v1341_v20, %s1414_s17 }
 0xd50   :  { %v847_v21 = vpop.permute.xlu1 %846 }
 0xd51   :  { %v849_v22 = vmul.f32 %v847_v21, %v830_v7  ;;  %v787_v23 = vpop.permute.xlu2 %786 }
 0xd52   :  { %v789_v24 = vmul.f32 %v787_v23, %v770_v11 }
 0xd53   :  { %851 = vrot.lane.b32.xlu0 %v849_v22, %s1415_s18 }
 0xd54   :  { %855 = vrot.lane.b32.xlu1 %v789_v24, %s1414_s17 }
 0xdc5   :  { %v852_v26 = vpop.permute.xlu0 %851 }
 0xdc6   :  { %1235 = vmatmul.msk.f32.vlgmr.msrb.gmra.mxu3 %vm146_vm6, %v852_v26  ;;  %v856_v27 = vpop.permute.xlu1 %855 }
 0xdc7   :  { %v858_v30 = vsel %vm146_vm6, %v852_v26, %v856_v27  ;;  %v1803_v26 = vld [vmem:[%s1834_s5] ss:$0 sm:$0xff] }
 0xdc8   :  { %1233 = vmatmul.msk.f32.vlgmr.msrb.gmra.mxu1 %vm213_vm7, %v858_v30 }
 0xe45   :  { %v879_v44 = vpop.f32.mrf.mxu1 }
 0xe46   :  { %v880_v41 = vadd.f32 %v1611_v50, %v879_v44 }
 0xe48   :  { %1342 = vtanh.f32 %v880_v41  ;;  %v1234_v46 = vmul.f32 -1.442695, %v880_v41 }
 0xe49   :  { %v938_v45 = vpop.f32.mrf.mxu3 }
 0xe4a   :  { %v941_v43 = vadd.f32 %v938_v45, %v125_v31 }
 0xe4c   :  { %1344 = vtanh.f32 %v941_v43  ;;  %v1236_v40 = vmul.f32 -1.442695, %v941_v43 }
 0xe4d   :  { %1346 = vpow2.f32 %v1234_v46 }
 0xe4e   :  { %v1343_v47 = vpop.eup %1342 }
 0xe4f   :  { %904 = vrot.lane.b32.xlu2 %v1343_v47, %s1414_s17 }
 0xe52   :  { %v1345_v48 = vpop.eup %1344 }
 0xe53   :  { %964 = vrot.lane.b32.xlu0 %v1345_v48, %s1414_s17  ;;  %v1347_v50 = vpop.eup %1346 }
 0xe54   :  { %v885_v28 = vadd.f32 1.0, %v1347_v50 }
 0xe56   :  { %1348 = vrcp.f32 %v885_v28  ;;  %v897_v2 = vand.u32 2147483648, %v885_v28  ;;  %vm891_vm10 = vweird.f32 %v885_v28  ;;  %v895_v5 = vand.u32 2147483647, %v885_v28 }
 0xe57   :  { %1350 = vpow2.f32 %v1236_v40 }
 0xe58   :  { %v898_v55 = vor.u32 1.1754944e-38, %v897_v2  ;;  %vm896_vm12 = vcmp.eq.f32.partialorder %v895_v5, 8.507059e+37 }
 0xe5c   :  { %v1349_v49 = vpop.eup %1348 }
 0xe5d   :  { %v887_v51 = vmul.f32 %v1349_v49, %v885_v28  ;;  %v1351_v54 = vpop.eup %1350  ;;  %vm892_vm9 = vweird.f32 %v1349_v49 }
 0xe5e   :  { %v945_v6 = vadd.f32 1.0, %v1351_v54  ;;  %vm893_vm11 = vmor %vm891_vm10, %vm892_vm9 }
 0xe5f   :  { %v888_v52 = vsub.f32 1.0, %v887_v51 }
 0xe60   :  { %1352 = vrcp.f32 %v945_v6  ;;  %v957_v38 = vand.u32 2147483648, %v945_v6  ;;  %vm951_vm14 = vweird.f32 %v945_v6  ;;  %v955_v39 = vand.u32 2147483647, %v945_v6 }
 0xe61   :  { %v889_v53 = vmul.f32 %v1349_v49, %v888_v52 }
 0xe62   :  { %v958_v59 = vor.u32 1.1754944e-38, %v957_v38  ;;  %vm956_vm0 = vcmp.eq.f32.partialorder %v955_v39, 8.507059e+37 }
 0xe63   :  { %v890_v1 = vadd.f32 %v1349_v49, %v889_v53 }
 0xe65   :  { %v894_v8 = vsel %vm893_vm11, %v1349_v49, %v890_v1 }
 0xe66   :  { %v899_v33 = vsel %vm896_vm12, %v898_v55, %v894_v8  ;;  %v1353_v58 = vpop.eup %1352 }
 0xe67   :  { %v947_v34 = vmul.f32 %v1353_v58, %v945_v6  ;;  %vm952_vm13 = vweird.f32 %v1353_v58  ;;  %v902_v63 = vmul.f32 %v899_v33, %v1755_v19 }
 0xe68   :  { %vm953_vm15 = vmor %vm951_vm14, %vm952_vm13  ;;  %vm1196_vm14 = vcmask 7168  }
 0xe69   :  { %v948_v35 = vsub.f32 1.0, %v947_v34 }
 0xe6b   :  { %v949_v36 = vmul.f32 %v1353_v58, %v948_v35 }
 0xe6d   :  { %v950_v37 = vadd.f32 %v1353_v58, %v949_v36 }
 0xe6f   :  { %v954_v42 = vsel %vm953_vm15, %v1353_v58, %v950_v37 }
 0xe70   :  { %v959_v61 = vsel %vm956_vm0, %v958_v59, %v954_v42 }
 0xe71   :  { %v962_v4 = vmul.f32 %v959_v61, %v1750_v15  ;;  %v54_v15 = vld [vmem:[%s1829_s0 + $0x38] sm:$0xff] }
 0xe72   :  { %1211 = vmatmul.msk.f32.gmra.mxu0 %vm60_vm1, %v54_v15  ;;  %v1252_v15 = vld [vmem:[%s1835_s6] ss:$0 sm:$0xff] }
 0xea9   :  { %v905_v56 = vpop.permute.xlu2 %904 }
 0xeaa   :  { %v907_v57 = vmul.f32 %v905_v56, %v899_v33 }
 0xeac   :  { %909 = vrot.lane.b32.xlu1 %v907_v57, %s1415_s18 }
 0xec5   :  { %v965_v60 = vpop.permute.xlu0 %964 }
 0xec6   :  { %v967_v62 = vmul.f32 %v965_v60, %v959_v61 }
 0xec8   :  { %969 = vrot.lane.b32.xlu2 %v967_v62, %s1415_s18 }
 0xeef   :  { %v127_v20 = vpop.f32.mrf.mxu0 }
 0xef0   :  { %v128_v21 = vadd.f32 %v1772_v29, %v127_v20 }
 0xf1e   :  { %v910_v0 = vpop.permute.xlu1 %909 }
 0xf1f   :  { %v1780_v3 = vadd.f32 %v910_v0, %v902_v63 }
 0xf21   :  { %1354 = vtanh.f32 %v1780_v3 }
 0xf22   :  { %v970_v7 = vpop.permute.xlu2 %969 }
 0xf23   :  { %v1784_v9 = vadd.f32 %v970_v7, %v962_v4 }
 0xf25   :  { %1356 = vtanh.f32 %v1784_v9 }
 0xf27   :  { %v1355_v10 = vpop.eup %1354 }
 0xf28   :  { %915 = vrot.lane.b32.xlu0 %v1355_v10, %s1414_s17 }
 0xf2b   :  { %v1357_v11 = vpop.eup %1356 }
 0xf2c   :  { %975 = vrot.lane.b32.xlu1 %v1357_v11, %s1414_s17 }
 0xf9a   :  { %v916_v12 = vpop.permute.xlu0 %915 }
 0xf9b   :  { %v918_v13 = vmul.f32 %v916_v12, %v899_v33 }
 0xf9d   :  { %984 = vrot.lane.b32.xlu0 %v918_v13, %s1414_s17 }
 0xf9e   :  { %v976_v14 = vpop.permute.xlu1 %975 }
 0xf9f   :  { %v978_v16 = vmul.f32 %v976_v14, %v959_v61 }
 0xfa1   :  { %980 = vrot.lane.b32.xlu2 %v978_v16, %s1415_s18 }
 0xffb   :  { %v981_v17 = vpop.permute.xlu2 %980 }
 0xffc   :  { %1239 = vmatmul.msk.f32.vlgmr.msra.gmra.mxu3 %vm146_vm6, %v981_v17 }
0x100f   :  { %v985_v18 = vpop.permute.xlu0 %984 }
0x1010   :  { %v987_v19 = vsel %vm146_vm6, %v981_v17, %v985_v18 }
0x1011   :  { %1237 = vmatmul.msk.f32.vlgmr.msrb.gmra.mxu2 %vm213_vm7, %v987_v19 }
0x107f   :  { %v1067_v22 = vpop.f32.mrf.mxu3 }
0x1080   :  { %v1070_v23 = vadd.f32 %v1067_v22, %v128_v21 }
0x1082   :  { %1358 = vtanh.f32 %v1070_v23  ;;  %v1240_v32 = vmul.f32 -1.442695, %v1070_v23 }
0x1088   :  { %v1359_v24 = vpop.eup %1358 }
0x1089   :  { %1093 = vrot.lane.b32.xlu2 %v1359_v24, %s1414_s17 }
0x1094   :  { %v1008_v25 = vpop.f32.mrf.mxu2 }
0x1095   :  { %v1009_v27 = vadd.f32 %v1803_v26, %v1008_v25 }
0x1097   :  { %1360 = vtanh.f32 %v1009_v27  ;;  %v1238_v49 = vmul.f32 -1.442695, %v1009_v27 }
0x1098   :  { %1362 = vpow2.f32 %v1240_v32 }
0x109d   :  { %v1361_v30 = vpop.eup %1360 }
0x109e   :  { %1033 = vrot.lane.b32.xlu1 %v1361_v30, %s1414_s17  ;;  %v1363_v44 = vpop.eup %1362 }
0x109f   :  { %v1074_v41 = vadd.f32 1.0, %v1363_v44 }
0x10a1   :  { %1364 = vrcp.f32 %v1074_v41  ;;  %v1086_v48 = vand.u32 2147483648, %v1074_v41  ;;  %vm1080_vm2 = vweird.f32 %v1074_v41  ;;  %v1084_v46 = vand.u32 2147483647, %v1074_v41 }
0x10a2   :  { %1366 = vpow2.f32 %v1238_v49 }
0x10a3   :  { %v1087_v28 = vor.u32 1.1754944e-38, %v1086_v48  ;;  %vm1085_vm4 = vcmp.eq.f32.partialorder %v1084_v46, 8.507059e+37 }
0x10a7   :  { %v1365_v29 = vpop.eup %1364 }
0x10a8   :  { %v1076_v31 = vmul.f32 %v1365_v29, %v1074_v41  ;;  %vm1081_vm1 = vweird.f32 %v1365_v29  ;;  %v1367_v53 = vpop.eup %1366 }
0x10a9   :  { %vm1082_vm3 = vmor %vm1080_vm2, %vm1081_vm1  ;;  %v1014_v54 = vadd.f32 1.0, %v1367_v53 }
0x10aa   :  { %v1077_v45 = vsub.f32 1.0, %v1076_v31 }
0x10ab   :  { %1368 = vrcp.f32 %v1014_v54  ;;  %v1026_v55 = vand.u32 2147483648, %v1014_v54  ;;  %vm1020_vm8 = vweird.f32 %v1014_v54  ;;  %v1024_v56 = vand.u32 2147483647, %v1014_v54 }
0x10ac   :  { %v1078_v43 = vmul.f32 %v1365_v29, %v1077_v45 }
0x10ad   :  { %v1027_v57 = vor.u32 1.1754944e-38, %v1026_v55  ;;  %vm1025_vm10 = vcmp.eq.f32.partialorder %v1024_v56, 8.507059e+37 }
0x10ae   :  { %v1079_v47 = vadd.f32 %v1365_v29, %v1078_v43 }
0x10b0   :  { %v1083_v50 = vsel %vm1082_vm3, %v1365_v29, %v1079_v47 }
0x10b1   :  { %v1088_v40 = vsel %vm1085_vm4, %v1087_v28, %v1083_v50  ;;  %v1369_v1 = vpop.eup %1368  ;;  %v1253_v50 = vld [vmem:[#allocation2] ss:$0 sm:$0xff] }
0x10b2   :  { %v1016_v2 = vmul.f32 %v1369_v1, %v1014_v54  ;;  %vm1021_vm5 = vweird.f32 %v1369_v1  ;;  %v1091_v36 = vmul.f32 %v1088_v40, %v1784_v9 }
0x10b3   :  { %vm1022_vm9 = vmor %vm1020_vm8, %vm1021_vm5 }
0x10b4   :  { %v1017_v5 = vsub.f32 1.0, %v1016_v2 }
0x10b6   :  { %v1018_v6 = vmul.f32 %v1369_v1, %v1017_v5 }
0x10b8   :  { %v1019_v8 = vadd.f32 %v1369_v1, %v1018_v6 }
0x10ba   :  { %v1023_v33 = vsel %vm1022_vm9, %v1369_v1, %v1019_v8 }
0x10bb   :  { %v1028_v34 = vsel %vm1025_vm10, %v1027_v57, %v1023_v33 }
0x10bc   :  { %v1031_v42 = vmul.f32 %v1028_v34, %v1780_v3 }
0x10e3   :  { %v1094_v51 = vpop.permute.xlu2 %1093 }
0x10e4   :  { %v1096_v52 = vmul.f32 %v1094_v51, %v1088_v40 }
0x10e6   :  { %1098 = vrot.lane.b32.xlu1 %v1096_v52, %s1415_s18 }
0x1110   :  { %v1034_v58 = vpop.permute.xlu1 %1033 }
0x1111   :  { %v1036_v35 = vmul.f32 %v1034_v58, %v1028_v34 }
0x1113   :  { %1038 = vrot.lane.b32.xlu0 %v1036_v35, %s1415_s18 }
0x1158   :  { %v1099_v37 = vpop.permute.xlu1 %1098 }
0x1159   :  { %v1101_v38 = vadd.f32 %v1099_v37, %v1091_v36 }
0x115b   :  { %1370 = vtanh.f32 %v1101_v38 }
0x1161   :  { %v1371_v39 = vpop.eup %1370 }
0x1162   :  { %1104 = vrot.lane.b32.xlu0 %v1371_v39, %s1414_s17 }
0x1185   :  { %v1039_v59 = vpop.permute.xlu0 %1038 }
0x1186   :  { %v1041_v60 = vadd.f32 %v1039_v59, %v1031_v42 }
0x1188   :  { %1372 = vtanh.f32 %v1041_v60 }
0x118e   :  { %v1373_v61 = vpop.eup %1372 }
0x118f   :  { %1044 = vrot.lane.b32.xlu2 %v1373_v61, %s1414_s17 }
0x11d4   :  { %v1105_v62 = vpop.permute.xlu0 %1104 }
0x11d5   :  { %v1107_v63 = vmul.f32 %v1105_v62, %v1088_v40 }
0x11d7   :  { %1109 = vrot.lane.b32.xlu1 %v1107_v63, %s1415_s18 }
0x11e9   :  { %v1045_v0 = vpop.permute.xlu2 %1044 }
0x11ea   :  { %v1047_v4 = vmul.f32 %v1045_v0, %v1028_v34 }
0x11ec   :  { %1113 = vrot.lane.b32.xlu2 %v1047_v4, %s1414_s17 }
0x1246   :  { %v1114_v7 = vpop.permute.xlu2 %1113 }
0x1249   :  { %v1110_v9 = vpop.permute.xlu1 %1109 }
0x124a   :  { %v1116_v10 = vsel %vm146_vm6, %v1110_v9, %v1114_v7 }
0x124b   :  { %1241 = vmatmul.msk.f32.vlgmr.msrb.gmra.mxu0 %vm213_vm7, %v1116_v10 }
0x12c8   :  { %v1137_v3 = vpop.f32.mrf.mxu0 }
0x12c9   :  { %v1138_v11 = vadd.f32 %v1803_v26, %v1137_v3 }
0x12cb   :  { %1374 = vtanh.f32 %v1138_v11  ;;  %v1242_v13 = vmul.f32 -1.442695, %v1138_v11 }
0x12cd   :  { %1376 = vpow2.f32 %v1242_v13 }
0x12d1   :  { %v1375_v12 = vpop.eup %1374 }
0x12d2   :  { %1162 = vrot.lane.b32.xlu0 %v1375_v12, %s1414_s17 }
0x12d3   :  { %v1377_v14 = vpop.eup %1376 }
0x12d4   :  { %v1143_v16 = vadd.f32 1.0, %v1377_v14 }
0x12d6   :  { %1378 = vrcp.f32 %v1143_v16  ;;  %v1155_v22 = vand.u32 2147483648, %v1143_v16  ;;  %vm1149_vm11 = vweird.f32 %v1143_v16  ;;  %v1153_v23 = vand.u32 2147483647, %v1143_v16 }
0x12d8   :  { %v1156_v25 = vor.u32 1.1754944e-38, %v1155_v22  ;;  %vm1154_vm13 = vcmp.eq.f32.partialorder %v1153_v23, 8.507059e+37 }
0x12da   :  { %1180 = vrot.lane.b32.xlu0 %v1252_v15, %s1416_s30 }
0x12dc   :  { %v1379_v17 = vpop.eup %1378 }
0x12dd   :  { %v1145_v18 = vmul.f32 %v1379_v17, %v1143_v16  ;;  %vm1150_vm7 = vweird.f32 %v1379_v17 }
0x12de   :  { %vm1151_vm12 = vmor %vm1149_vm11, %vm1150_vm7 }
0x12df   :  { %v1146_v19 = vsub.f32 1.0, %v1145_v18 }
0x12e1   :  { %v1147_v20 = vmul.f32 %v1379_v17, %v1146_v19 }
0x12e3   :  { %v1148_v21 = vadd.f32 %v1379_v17, %v1147_v20 }
0x12e5   :  { %v1152_v24 = vsel %vm1151_vm12, %v1379_v17, %v1148_v21 }
0x12e6   :  { %v1157_v27 = vsel %vm1154_vm13, %v1156_v25, %v1152_v24 }
0x12e7   :  { %v1160_v32 = vmul.f32 %v1157_v27, %v1041_v60 }
0x1344   :  { %v1163_v26 = vpop.permute.xlu0 %1162 }
0x1345   :  { %v1165_v30 = vmul.f32 %v1163_v26, %v1157_v27 }
0x1347   :  { %1167 = vrot.lane.b32.xlu1 %v1165_v30, %s1415_s18 }
0x134c   :  { %v1181_v45 = vpop.permute.xlu0 %1180 }
0x13b9   :  { %v1168_v44 = vpop.permute.xlu1 %1167 }
0x13ba   :  { %v1170_v41 = vadd.f32 %v1168_v44, %v1160_v32 }
0x13bc   :  { %1380 = vtanh.f32 %v1170_v41 }
0x13c2   :  { %v1381_v29 = vpop.eup %1380 }
0x13c3   :  { %1173 = vrot.lane.b32.xlu2 %v1381_v29, %s1414_s17 }
0x141d   :  { %v1174_v31 = vpop.permute.xlu2 %1173 }
0x141e   :  { %v1176_v43 = vmul.f32 %v1174_v31, %v1157_v27 }
0x1420   :  { %v1183_v47 = vmul.f32 %v1181_v45, %v1176_v43 }
0x1422   :  { %1185 = vrot.lane.b32.xlu1 %v1183_v47, %s1415_s18 }
0x1494   :  { %v1186_v48 = vpop.permute.xlu1 %1185 }
0x1495   :  { %v1188_v46 = vsel %vm146_vm6, %v1186_v48, 0.0 }
0x1496   :  { %1189 = vadd.xlane.f32.xlu2 %v1188_v46 }
0x1509   :  { %v1190_v28 = vpop.xlane.xlu2 %1189 }
0x150a   :  { %v1195_v49 = vadd.f32 %v1253_v50, %v1190_v28 }
0x150c   :  { %1197 = vst.msk [vmem:[%s1837_s8] sm:$0xff] %vm1196_vm14, %v1195_v49 }
0x150d   :  { %1202 = vsyncpa [#allocation4], 1 }

</bundles_post_ra>
